<compile_context>
chip_gen: v7x
topology: tpu7x:2x2x1
jax: 0.10.0
libtpu: 0.0.40
codegen_flags: <defaults>
</compile_context>

<pallas_src>
import jax
import jax.numpy as jnp
from jax import lax
from jax.experimental import pallas as pl
from jax.experimental.pallas import tpu as pltpu

H = 16
W = 16
C_IN, C1, C2, C_OUT = 6, 32, 16, 3
BN_EPS = 1e-5

L_IN, L1, L2, L_OUT = W * C_IN, W * C1, W * C2, W * C_OUT


def _make_umm_kernel(bb):
    """Kernel processing `bb` images per grid step, activations (bb*H, W*C)."""
    rows = bb * H

    def umm_kernel(x_ref, w1_ref, t1_ref, w2_ref, t2_ref, w3_ref, b3_ref, o_ref):
        # Row r of the block is pixel row h = r % H of image r // H.  The
        # rolled source row for the dy=+/-1 taps is invalid (== zero padding)
        # when it crosses the top/bottom image boundary; the same mask kills
        # cross-image leakage inside the block and the roll wrap-around row.
        h = lax.broadcasted_iota(jnp.int32, (rows, 1), 0) % H
        valid_m1 = h > 0          # source row r-1 exists  (dy = -1 tap)
        valid_p1 = h < H - 1      # source row r+1 exists  (dy = +1 tap)

        def conv3x3(act, w_ref):
            # act: (rows, W*Cin) f32.  w_ref: (3, W*Cin, W*Cout) bf16, one
            # block-tridiagonal matrix per kernel row dy; the 1x3 column taps
            # and SAME padding along W are baked into it.
            acc = jnp.dot(act.astype(jnp.bfloat16), w_ref[1],
                          preferred_element_type=jnp.float32)
            up = jnp.where(valid_m1, pltpu.roll(act, shift=1, axis=0), 0.0)
            acc = acc + jnp.dot(up.astype(jnp.bfloat16), w_ref[0],
                                preferred_element_type=jnp.float32)
            dn = jnp.where(valid_p1, pltpu.roll(act, shift=rows - 1, axis=0), 0.0)
            acc = acc + jnp.dot(dn.astype(jnp.bfloat16), w_ref[2],
                                preferred_element_type=jnp.float32)
            return acc

        x = x_ref[...]                                              # (rows, 96) f32
        y1 = jnp.maximum(conv3x3(x, w1_ref) + t1_ref[...], 0.0)     # (rows, 512)
        y2 = jnp.maximum(conv3x3(y1, w2_ref) + t2_ref[...], 0.0)    # (rows, 256)
        y3 = jnp.dot(y2.astype(jnp.bfloat16), w3_ref[...],
                     preferred_element_type=jnp.float32) + b3_ref[...]
        o_ref[...] = y3                                             # (rows, 48)

    return umm_kernel


def _band_weights_3x3(k_hwio):
    """Fold a 3x3 HWIO kernel into 3 block-tridiagonal (W*Cin, W*Cout) mats.

    mats[ky][wi*Cin + ci, wo*Cout + co] = k[ky, kx, ci, co] where wi = wo + (kx-1),
    zero where the source column falls outside the image (SAME padding).
    """
    mats = []
    for ky in range(3):
        m = None
        for kx in range(3):
            dx = kx - 1
            sel = jnp.eye(W, k=-dx, dtype=jnp.float32)  # sel[wi, wo] = 1 iff wi == wo + dx
            term = jnp.kron(sel, k_hwio[ky, kx])
            m = term if m is None else m + term
        mats.append(m)
    return jnp.stack(mats, axis=0)


def utility_matching_forward(x_nchw, params, block_b=16):
    """x_nchw: (N, 6, H, W) float32 -> (N, 3, H, W) float32."""
    w1, s1, t1, w2, s2, t2, w3, b3 = params
    n = x_nchw.shape[0]

    # Fold BN (inference) scale into the conv weights, build the banded matmul
    # weights (W taps + SAME padding baked in), cast MXU operands to bf16.
    w1t = _band_weights_3x3(w1 * s1[0]).astype(jnp.bfloat16)            # (3, 96, 512)
    w2t = _band_weights_3x3(w2 * s2[0]).astype(jnp.bfloat16)            # (3, 512, 256)
    w3t = jnp.kron(jnp.eye(W, dtype=jnp.float32), w3).astype(jnp.bfloat16)  # (256, 48)
    t1l = jnp.tile(t1.astype(jnp.float32), (1, W))                      # (1, 512)
    t2l = jnp.tile(t2.astype(jnp.float32), (1, W))                      # (1, 256)
    b3l = jnp.tile(b3.astype(jnp.float32), (1, W))                      # (1, 48)

    # Images per grid step; keep the "parallel" grid >= 2 whenever possible so
    # a 2-TensorCore chip (v7x megacore) can shard it.
    bb = max(1, min(block_b, n))
    if n >= 2:
        bb = min(bb, max(1, n // 2))
    n_pad = ((n + bb - 1) // bb) * bb
    rows = bb * H

    # NCHW -> lane-dense (batch*H, W*C_IN) rows.
    x = jnp.transpose(x_nchw, (0, 2, 3, 1)).astype(jnp.float32).reshape(n * H, L_IN)
    if n_pad != n:
        x = jnp.pad(x, ((0, (n_pad - n) * H), (0, 0)))

    out = pl.pallas_call(
        _make_umm_kernel(bb),
        out_shape=jax.ShapeDtypeStruct((n_pad * H, L_OUT), jnp.float32),
        grid_spec=pltpu.PrefetchScalarGridSpec(
            num_scalar_prefetch=0,
            grid=(n_pad // bb,),
            in_specs=[
                pl.BlockSpec((rows, L_IN), lambda i: (i, 0)),
                pl.BlockSpec((3, L_IN, L1), lambda i: (0, 0, 0)),
                pl.BlockSpec((1, L1), lambda i: (0, 0)),
                pl.BlockSpec((3, L1, L2), lambda i: (0, 0, 0)),
                pl.BlockSpec((1, L2), lambda i: (0, 0)),
                pl.BlockSpec((L2, L_OUT), lambda i: (0, 0)),
                pl.BlockSpec((1, L_OUT), lambda i: (0, 0)),
            ],
            out_specs=pl.BlockSpec((rows, L_OUT), lambda i: (i, 0)),
        ),
        compiler_params=pltpu.CompilerParams(
            dimension_semantics=("parallel",)),
    )(x, w1t, t1l, w2t, t2l, w3t, b3l)

    # (n*H, W*C_OUT) rows -> NCHW; tiny reshape + transpose handled by XLA.
    out = out[:n * H].reshape(n, H, W, C_OUT)
    return jnp.transpose(out, (0, 3, 1, 2))


def make_params(key):
    """Deterministic synthetic parameters matching the PyTorch module shapes."""
    ks = jax.random.split(key, 12)

    def conv_w(k, kh, kw, cin, cout):
        std = (2.0 / (kh * kw * cin)) ** 0.5
        return std * jax.random.normal(k, (kh, kw, cin, cout), jnp.float32)

    w1 = conv_w(ks[0], 3, 3, C_IN, C1)
    w2 = conv_w(ks[1], 3, 3, C1, C2)
    w3 = conv_w(ks[2], 1, 1, C2, C_OUT).reshape(C2, C_OUT)
    b3 = 0.1 * jax.random.normal(ks[3], (1, C_OUT), jnp.float32)

    def bn_fold(kg, kb, km, kv, c):
        gamma = 1.0 + 0.1 * jax.random.normal(kg, (c,), jnp.float32)
        beta = 0.1 * jax.random.normal(kb, (c,), jnp.float32)
        mean = 0.1 * jax.random.normal(km, (c,), jnp.float32)
        var = 1.0 + 0.1 * jax.random.uniform(kv, (c,), jnp.float32)
        scale = gamma / jnp.sqrt(var + BN_EPS)
        shift = beta - mean * scale
        return scale.reshape(1, c), shift.reshape(1, c)

    s1, t1 = bn_fold(ks[4], ks[5], ks[6], ks[7], C1)
    s2, t2 = bn_fold(ks[8], ks[9], ks[10], ks[11], C2)
    return (w1, s1, t1, w2, s2, t2, w3, b3)


def reference_forward(x_nchw, params, operand_dtype=jnp.float32):
    """Pure-JAX (XLA conv) reference.  With operand_dtype=bfloat16 it mirrors
    the kernel's bf16-operand / f32-accumulate arithmetic (same BN folding,
    same cast points), so only summation order differs."""
    w1, s1, t1, w2, s2, t2, w3, b3 = params
    w1f = (w1 * s1[0]).astype(operand_dtype)
    w2f = (w2 * s2[0]).astype(operand_dtype)
    w3c = w3.astype(operand_dtype)
    x = jnp.transpose(x_nchw, (0, 2, 3, 1)).astype(jnp.float32)

    def conv(lhs, rhs):
        dn = lax.conv_dimension_numbers(lhs.shape, rhs.shape,
                                        ('NHWC', 'HWIO', 'NHWC'))
        return lax.conv_general_dilated(
            lhs.astype(operand_dtype), rhs, (1, 1), 'SAME',
            dimension_numbers=dn, preferred_element_type=jnp.float32,
            precision=lax.Precision.HIGHEST)

    y = jnp.maximum(conv(x, w1f) + t1[0], 0.0)
    y = jnp.maximum(conv(y, w2f) + t2[0], 0.0)
    y = jnp.einsum('nhwc,co->nhwo', y.astype(operand_dtype), w3c,
                   preferred_element_type=jnp.float32,
                   precision=lax.Precision.HIGHEST) + b3[0]
    return jnp.transpose(y, (0, 3, 1, 2))


if __name__ == "__main__":
    key = jax.random.PRNGKey(0)
    k_x, k_p = jax.random.split(key)
    # combined_feature = concat(demand map D, confidence map C): 6 channels, NCHW.
    x = jax.random.normal(k_x, (2, C_IN, H, W), jnp.float32)
    params = make_params(k_p)

    fwd = jax.jit(utility_matching_forward)
    out = jax.block_until_ready(fwd(x, params))
    assert out.shape == (2, C_OUT, H, W), out.shape

    # (1) Tight check against a reference that mirrors the kernel's
    #     bf16-operand / f32-accumulate arithmetic.  Any indexing / roll /
    #     mask / banded-weight error would show up as O(0.1..1) differences,
    #     far above this tolerance, so the loose check below can't hide it.
    ref_bf16 = jax.block_until_ready(reference_forward(x, params, jnp.bfloat16))
    err_bf16 = float(jnp.max(jnp.abs(out - ref_bf16)))
    assert jnp.allclose(out, ref_bf16, atol=1e-2, rtol=1e-2), err_bf16

    # (2) Accuracy check against the full-precision (f32 HIGHEST) reference;
    #     tolerance reflects the intentional bf16 operand rounding.
    ref_f32 = jax.block_until_ready(reference_forward(x, params, jnp.float32))
    err_f32 = float(jnp.max(jnp.abs(out - ref_f32)))
    assert jnp.allclose(out, ref_f32, atol=5e-2, rtol=5e-2), err_f32

    print("KERNEL_OK")
</pallas_src>

<mosaic_0001>
module attributes {stable_mosaic.version = 11 : i64} {
  func.func @umm_kernel(%arg0: i32, %arg1: memref<16x96xf32, #tpu.memory_space<vmem>>, %arg2: memref<3x96x512xbf16, #tpu.memory_space<vmem>>, %arg3: memref<1x512xf32, #tpu.memory_space<vmem>>, %arg4: memref<3x512x256xbf16, #tpu.memory_space<vmem>>, %arg5: memref<1x256xf32, #tpu.memory_space<vmem>>, %arg6: memref<256x48xbf16, #tpu.memory_space<vmem>>, %arg7: memref<1x48xf32, #tpu.memory_space<vmem>>, %arg8: memref<16x48xf32, #tpu.memory_space<vmem>>) attributes {dimension_semantics = [#tpu.dimension_semantics<parallel>], iteration_bounds = array<i64: 2>, scalar_prefetch = 0 : i64, scratch_operands = 0 : i64, tpu.core_type = #tpu.core_type<tc>, window_params = [{transform_indices = @transform_0, window_bounds = array<i64: 16, 96>}, {pipeline_mode = #tpu.pipeline_mode<synchronous>, transform_indices = @transform_1, window_bounds = array<i64: 3, 96, 512>}, {pipeline_mode = #tpu.pipeline_mode<synchronous>, transform_indices = @transform_2, window_bounds = array<i64: 1, 512>}, {pipeline_mode = #tpu.pipeline_mode<synchronous>, transform_indices = @transform_3, window_bounds = array<i64: 3, 512, 256>}, {pipeline_mode = #tpu.pipeline_mode<synchronous>, transform_indices = @transform_4, window_bounds = array<i64: 1, 256>}, {pipeline_mode = #tpu.pipeline_mode<synchronous>, transform_indices = @transform_5, window_bounds = array<i64: 256, 48>}, {pipeline_mode = #tpu.pipeline_mode<synchronous>, transform_indices = @transform_6, window_bounds = array<i64: 1, 48>}, {transform_indices = @transform_7, window_bounds = array<i64: 16, 48>}]} {
    %0 = tpu.iota {dimensions = array<i32: 0>} : vector<16x1xi32>
    %c16_i32 = arith.constant 16 : i32
    %c0_i32 = arith.constant 0 : i32
    %1 = arith.cmpi eq, %c16_i32, %c0_i32 : i32
    %c1_i32 = arith.constant 1 : i32
    %2 = arith.select %1, %c1_i32, %c16_i32 : i32
    %3 = vector.broadcast %2 : i32 to vector<16x1xi32>
    %4 = arith.remsi %0, %3 : vector<16x1xi32>
    %c0_i32_0 = arith.constant 0 : i32
    %5 = vector.broadcast %c0_i32_0 : i32 to vector<16x1xi32>
    %6 = arith.cmpi ne, %4, %5 : vector<16x1xi32>
    %c0_i32_1 = arith.constant 0 : i32
    %7 = vector.broadcast %c0_i32_1 : i32 to vector<16x1xi32>
    %8 = arith.cmpi slt, %4, %7 : vector<16x1xi32>
    %c0_i32_2 = arith.constant 0 : i32
    %9 = arith.cmpi slt, %2, %c0_i32_2 : i32
    %10 = vector.broadcast %9 : i1 to vector<16x1xi1>
    %11 = vector.broadcast %10 : vector<16x1xi1> to vector<16x1xi1>
    %12 = arith.xori %8, %11 : vector<16x1xi1>
    %13 = arith.andi %12, %6 : vector<16x1xi1>
    %14 = vector.broadcast %2 : i32 to vector<16x1xi32>
    %15 = arith.addi %4, %14 : vector<16x1xi32>
    %16 = arith.select %13, %15, %4 : vector<16x1xi1>, vector<16x1xi32>
    %c0_i32_3 = arith.constant 0 : i32
    %17 = vector.broadcast %c0_i32_3 : i32 to vector<16x1xi32>
    %18 = arith.cmpi sgt, %16, %17 : vector<16x1xi32>
    %c15_i32 = arith.constant 15 : i32
    %19 = vector.broadcast %c15_i32 : i32 to vector<16x1xi32>
    %20 = arith.cmpi slt, %16, %19 : vector<16x1xi32>
    %c0 = arith.constant 0 : index
    %c0_4 = arith.constant 0 : index
    %21 = vector.load %arg1[%c0, %c0_4] : memref<16x96xf32, #tpu.memory_space<vmem>>, vector<16x96xf32>
    %22 = arith.truncf %21 : vector<16x96xf32> to vector<16x96xbf16>
    %c1 = arith.constant 1 : index
    %c0_5 = arith.constant 0 : index
    %c0_6 = arith.constant 0 : index
    %23 = vector.load %arg2[%c1, %c0_5, %c0_6] : memref<3x96x512xbf16, #tpu.memory_space<vmem>>, vector<1x96x512xbf16>
    %24 = vector.shape_cast %23 : vector<1x96x512xbf16> to vector<96x512xbf16>
    %cst = arith.constant dense<0.000000e+00> : vector<16x512xf32>
    %25 = tpu.matmul %22, %24, %cst {dimension_numbers = #tpu.dot_dimension_numbers<[1], [0], [0], [1], [0, 0, 1, 1], [], []>} : vector<16x96xbf16>, vector<96x512xbf16>, vector<16x512xf32> -> vector<16x512xf32>
    %c1_i32_7 = arith.constant 1 : i32
    %26 = tpu.dynamic_rotate %21 by %c1_i32_7 dim 0 : vector<16x96xf32>, i32 -> vector<16x96xf32>
    %cst_8 = arith.constant 0.000000e+00 : f32
    %27 = vector.shape_cast %18 : vector<16x1xi1> to vector<16x1xi1>
    %28 = vector.broadcast %27 : vector<16x1xi1> to vector<16x96xi1>
    %29 = vector.broadcast %cst_8 : f32 to vector<16x96xf32>
    %30 = arith.select %28, %26, %29 : vector<16x96xi1>, vector<16x96xf32>
    %31 = arith.truncf %30 : vector<16x96xf32> to vector<16x96xbf16>
    %c0_9 = arith.constant 0 : index
    %c0_10 = arith.constant 0 : index
    %c0_11 = arith.constant 0 : index
    %32 = vector.load %arg2[%c0_9, %c0_10, %c0_11] : memref<3x96x512xbf16, #tpu.memory_space<vmem>>, vector<1x96x512xbf16>
    %33 = vector.shape_cast %32 : vector<1x96x512xbf16> to vector<96x512xbf16>
    %cst_12 = arith.constant dense<0.000000e+00> : vector<16x512xf32>
    %34 = tpu.matmul %31, %33, %cst_12 {dimension_numbers = #tpu.dot_dimension_numbers<[1], [0], [0], [1], [0, 0, 1, 1], [], []>} : vector<16x96xbf16>, vector<96x512xbf16>, vector<16x512xf32> -> vector<16x512xf32>
    %35 = arith.addf %25, %34 : vector<16x512xf32>
    %c15_i32_13 = arith.constant 15 : i32
    %36 = tpu.dynamic_rotate %21 by %c15_i32_13 dim 0 : vector<16x96xf32>, i32 -> vector<16x96xf32>
    %cst_14 = arith.constant 0.000000e+00 : f32
    %37 = vector.shape_cast %20 : vector<16x1xi1> to vector<16x1xi1>
    %38 = vector.broadcast %37 : vector<16x1xi1> to vector<16x96xi1>
    %39 = vector.broadcast %cst_14 : f32 to vector<16x96xf32>
    %40 = arith.select %38, %36, %39 : vector<16x96xi1>, vector<16x96xf32>
    %41 = arith.truncf %40 : vector<16x96xf32> to vector<16x96xbf16>
    %c2 = arith.constant 2 : index
    %c0_15 = arith.constant 0 : index
    %c0_16 = arith.constant 0 : index
    %42 = vector.load %arg2[%c2, %c0_15, %c0_16] : memref<3x96x512xbf16, #tpu.memory_space<vmem>>, vector<1x96x512xbf16>
    %43 = vector.shape_cast %42 : vector<1x96x512xbf16> to vector<96x512xbf16>
    %cst_17 = arith.constant dense<0.000000e+00> : vector<16x512xf32>
    %44 = tpu.matmul %41, %43, %cst_17 {dimension_numbers = #tpu.dot_dimension_numbers<[1], [0], [0], [1], [0, 0, 1, 1], [], []>} : vector<16x96xbf16>, vector<96x512xbf16>, vector<16x512xf32> -> vector<16x512xf32>
    %45 = arith.addf %35, %44 : vector<16x512xf32>
    %c0_18 = arith.constant 0 : index
    %c0_19 = arith.constant 0 : index
    %46 = vector.load %arg3[%c0_18, %c0_19] : memref<1x512xf32, #tpu.memory_space<vmem>>, vector<1x512xf32>
    %47 = vector.broadcast %46 : vector<1x512xf32> to vector<16x512xf32>
    %48 = arith.addf %45, %47 : vector<16x512xf32>
    %cst_20 = arith.constant 0.000000e+00 : f32
    %49 = vector.broadcast %cst_20 : f32 to vector<16x512xf32>
    %50 = arith.maximumf %48, %49 : vector<16x512xf32>
    %51 = arith.truncf %50 : vector<16x512xf32> to vector<16x512xbf16>
    %c1_21 = arith.constant 1 : index
    %c0_22 = arith.constant 0 : index
    %c0_23 = arith.constant 0 : index
    %52 = vector.load %arg4[%c1_21, %c0_22, %c0_23] : memref<3x512x256xbf16, #tpu.memory_space<vmem>>, vector<1x512x256xbf16>
    %53 = vector.shape_cast %52 : vector<1x512x256xbf16> to vector<512x256xbf16>
    %cst_24 = arith.constant dense<0.000000e+00> : vector<16x256xf32>
    %54 = tpu.matmul %51, %53, %cst_24 {dimension_numbers = #tpu.dot_dimension_numbers<[1], [0], [0], [1], [0, 0, 1, 1], [], []>} : vector<16x512xbf16>, vector<512x256xbf16>, vector<16x256xf32> -> vector<16x256xf32>
    %c1_i32_25 = arith.constant 1 : i32
    %55 = tpu.dynamic_rotate %50 by %c1_i32_25 dim 0 : vector<16x512xf32>, i32 -> vector<16x512xf32>
    %cst_26 = arith.constant 0.000000e+00 : f32
    %56 = vector.shape_cast %18 : vector<16x1xi1> to vector<16x1xi1>
    %57 = vector.broadcast %56 : vector<16x1xi1> to vector<16x512xi1>
    %58 = vector.broadcast %cst_26 : f32 to vector<16x512xf32>
    %59 = arith.select %57, %55, %58 : vector<16x512xi1>, vector<16x512xf32>
    %60 = arith.truncf %59 : vector<16x512xf32> to vector<16x512xbf16>
    %c0_27 = arith.constant 0 : index
    %c0_28 = arith.constant 0 : index
    %c0_29 = arith.constant 0 : index
    %61 = vector.load %arg4[%c0_27, %c0_28, %c0_29] : memref<3x512x256xbf16, #tpu.memory_space<vmem>>, vector<1x512x256xbf16>
    %62 = vector.shape_cast %61 : vector<1x512x256xbf16> to vector<512x256xbf16>
    %cst_30 = arith.constant dense<0.000000e+00> : vector<16x256xf32>
    %63 = tpu.matmul %60, %62, %cst_30 {dimension_numbers = #tpu.dot_dimension_numbers<[1], [0], [0], [1], [0, 0, 1, 1], [], []>} : vector<16x512xbf16>, vector<512x256xbf16>, vector<16x256xf32> -> vector<16x256xf32>
    %64 = arith.addf %54, %63 : vector<16x256xf32>
    %c15_i32_31 = arith.constant 15 : i32
    %65 = tpu.dynamic_rotate %50 by %c15_i32_31 dim 0 : vector<16x512xf32>, i32 -> vector<16x512xf32>
    %cst_32 = arith.constant 0.000000e+00 : f32
    %66 = vector.shape_cast %20 : vector<16x1xi1> to vector<16x1xi1>
    %67 = vector.broadcast %66 : vector<16x1xi1> to vector<16x512xi1>
    %68 = vector.broadcast %cst_32 : f32 to vector<16x512xf32>
    %69 = arith.select %67, %65, %68 : vector<16x512xi1>, vector<16x512xf32>
    %70 = arith.truncf %69 : vector<16x512xf32> to vector<16x512xbf16>
    %c2_33 = arith.constant 2 : index
    %c0_34 = arith.constant 0 : index
    %c0_35 = arith.constant 0 : index
    %71 = vector.load %arg4[%c2_33, %c0_34, %c0_35] : memref<3x512x256xbf16, #tpu.memory_space<vmem>>, vector<1x512x256xbf16>
    %72 = vector.shape_cast %71 : vector<1x512x256xbf16> to vector<512x256xbf16>
    %cst_36 = arith.constant dense<0.000000e+00> : vector<16x256xf32>
    %73 = tpu.matmul %70, %72, %cst_36 {dimension_numbers = #tpu.dot_dimension_numbers<[1], [0], [0], [1], [0, 0, 1, 1], [], []>} : vector<16x512xbf16>, vector<512x256xbf16>, vector<16x256xf32> -> vector<16x256xf32>
    %74 = arith.addf %64, %73 : vector<16x256xf32>
    %c0_37 = arith.constant 0 : index
    %c0_38 = arith.constant 0 : index
    %75 = vector.load %arg5[%c0_37, %c0_38] : memref<1x256xf32, #tpu.memory_space<vmem>>, vector<1x256xf32>
    %76 = vector.broadcast %75 : vector<1x256xf32> to vector<16x256xf32>
    %77 = arith.addf %74, %76 : vector<16x256xf32>
    %cst_39 = arith.constant 0.000000e+00 : f32
    %78 = vector.broadcast %cst_39 : f32 to vector<16x256xf32>
    %79 = arith.maximumf %77, %78 : vector<16x256xf32>
    %80 = arith.truncf %79 : vector<16x256xf32> to vector<16x256xbf16>
    %c0_40 = arith.constant 0 : index
    %c0_41 = arith.constant 0 : index
    %81 = vector.load %arg6[%c0_40, %c0_41] : memref<256x48xbf16, #tpu.memory_space<vmem>>, vector<256x48xbf16>
    %cst_42 = arith.constant dense<0.000000e+00> : vector<16x48xf32>
    %82 = tpu.matmul %80, %81, %cst_42 {dimension_numbers = #tpu.dot_dimension_numbers<[1], [0], [0], [1], [0, 0, 1, 1], [], []>} : vector<16x256xbf16>, vector<256x48xbf16>, vector<16x48xf32> -> vector<16x48xf32>
    %c0_43 = arith.constant 0 : index
    %c0_44 = arith.constant 0 : index
    %83 = vector.load %arg7[%c0_43, %c0_44] : memref<1x48xf32, #tpu.memory_space<vmem>>, vector<1x48xf32>
    %84 = vector.broadcast %83 : vector<1x48xf32> to vector<16x48xf32>
    %85 = arith.addf %82, %84 : vector<16x48xf32>
    %c0_45 = arith.constant 0 : index
    %c0_46 = arith.constant 0 : index
    %86 = vector.load %arg8[%c0_45, %c0_46] : memref<16x48xf32, #tpu.memory_space<vmem>>, vector<16x48xf32>
    tpu.vector_store %arg8[%c0_45, %c0_46], %85 {strides = array<i32>} : memref<16x48xf32, #tpu.memory_space<vmem>>, vector<16x48xf32>,
    return
  }
  func.func @transform_0(%arg0: i32) -> (i32, i32) {
    %c0_i32 = arith.constant 0 : i32
    %c0_i32_0 = arith.constant 0 : i32
    return %arg0, %c0_i32 : i32, i32
  }
  func.func @transform_1(%arg0: i32) -> (i32, i32, i32) {
    %c0_i32 = arith.constant 0 : i32
    %c0_i32_0 = arith.constant 0 : i32
    %c0_i32_1 = arith.constant 0 : i32
    %c0_i32_2 = arith.constant 0 : i32
    return %c0_i32, %c0_i32_0, %c0_i32_1 : i32, i32, i32
  }
  func.func @transform_2(%arg0: i32) -> (i32, i32) {
    %c0_i32 = arith.constant 0 : i32
    %c0_i32_0 = arith.constant 0 : i32
    %c0_i32_1 = arith.constant 0 : i32
    return %c0_i32, %c0_i32_0 : i32, i32
  }
  func.func @transform_3(%arg0: i32) -> (i32, i32, i32) {
    %c0_i32 = arith.constant 0 : i32
    %c0_i32_0 = arith.constant 0 : i32
    %c0_i32_1 = arith.constant 0 : i32
    %c0_i32_2 = arith.constant 0 : i32
    return %c0_i32, %c0_i32_0, %c0_i32_1 : i32, i32, i32
  }
  func.func @transform_4(%arg0: i32) -> (i32, i32) {
    %c0_i32 = arith.constant 0 : i32
    %c0_i32_0 = arith.constant 0 : i32
    %c0_i32_1 = arith.constant 0 : i32
    return %c0_i32, %c0_i32_0 : i32, i32
  }
  func.func @transform_5(%arg0: i32) -> (i32, i32) {
    %c0_i32 = arith.constant 0 : i32
    %c0_i32_0 = arith.constant 0 : i32
    %c0_i32_1 = arith.constant 0 : i32
    return %c0_i32, %c0_i32_0 : i32, i32
  }
  func.func @transform_6(%arg0: i32) -> (i32, i32) {
    %c0_i32 = arith.constant 0 : i32
    %c0_i32_0 = arith.constant 0 : i32
    %c0_i32_1 = arith.constant 0 : i32
    return %c0_i32, %c0_i32_0 : i32, i32
  }
  func.func @transform_7(%arg0: i32) -> (i32, i32) {
    %c0_i32 = arith.constant 0 : i32
    %c0_i32_0 = arith.constant 0 : i32
    return %arg0, %c0_i32 : i32, i32
  }
}

</mosaic_0001>

<bundles_post_ra>
// kernel: utility_matching_forward.1
= control target key start
LH: loop header
LB: loop body
LE: loop exit
PB: predicated region body
PF: predicated region fallthrough
CT: control target
= control target key end

     0   :  { %s3850_s24 = smov 0   ;;  %s4923_s0 = inlined_call_operand.vmem [shape: f32[32,96], index: 0, kind: input, shape index: {}]   ;;  %s4924_s1 = inlined_call_operand.vmem [shape: bf16[3,96,512], index: 1, kind: input, shape index: {}]   ;;  %s4925_s2 = inlined_call_operand.vmem [shape: f32[1,512], index: 2, kind: input, shape index: {}]   ;;  %s4926_s3 = inlined_call_operand.vmem [shape: bf16[3,512,256], index: 3, kind: input, shape index: {}]   ;;  %s4927_s4 = inlined_call_operand.vmem [shape: f32[1,256], index: 4, kind: input, shape index: {}]   ;;  %s4928_s5 = inlined_call_operand.vmem [shape: bf16[256,48], index: 5, kind: input, shape index: {}]   ;;  %s4929_s6 = inlined_call_operand.vmem [shape: f32[1,48], index: 6, kind: input, shape index: {}]   ;;  %s4930_s7 = inlined_call_operand.vmem [shape: f32[32,48], index: 7, kind: output, shape index: {}]  }
   0x1 LB: > { %s2822_s25 = sadd.s32 4294967295, %s3806_s24   ;;  %p2826_p0 = scmp.ge.s32.totalorder %s3806_s24, 1  ;;  %s3806_s24 = sphi %s3850_s24, %s17_s24  }
   0x2   : > { %p238_p1 = scmp.lt.s32.totalorder %s3806_s24, 3 }
   0x4   : > { %p239_p2 = pnand %p2826_p0, %p238_p1 }
   0x5   : > { %v3388_v0 = vld [vmem:[%s4924_s1 + $0x4] ss:$16 sps:$4 sm:$0xff] (!%p239_p2)   ;;  %v3390_v1 = vld [vmem:[%s4924_s1 + $0xcc] ss:$16 sps:$4 sm:$0xff] (!%p239_p2)   ;;  %v3808_v2 = vmov (!%p239_p2), 0   ;;  %s2827_s30 = sshll.u32 (!%p239_p2), %s2822_s25, 1  ;;  %v283_v13 = vlaneseq (!%p239_p2) }
   0x6   : > { %242 = sbr.rel (%p239_p2) target bundleno = 901 (0x385), region = 48  ;;  %534 = vmatprep.mubr.bf16.mxu0 (!%p239_p2), %v3808_v2  ;;  %786 = vmatprep.mubr.bf16.mxu1 (!%p239_p2), %v3808_v2  ;;  %v3392_v3 = vld [vmem:[%s4924_s1] ss:$16 sps:$4 sm:$0xff] (!%p239_p2)   ;;  %v3393_v4 = vld [vmem:[%s4924_s1 + $0xc8] ss:$16 sps:$4 sm:$0xff] (!%p239_p2)   ;;  %p271_p3 = scmp.lt.s32.totalorder (!%p239_p2), %s2827_s30, 3 }
   0x7   : > { %502 = vmatprep.subr.bf16.mxu0 (!%p239_p2), %v3388_v0  ;;  %754 = vmatprep.subr.bf16.mxu1 (!%p239_p2), %v3390_v1  ;;  %v3394_v5 = vld [vmem:[%s4924_s1 + $0x24] ss:$16 sps:$4 sm:$0xff] (!%p239_p2)   ;;  %v3396_v6 = vld [vmem:[%s4924_s1 + $0xec] ss:$16 sps:$4 sm:$0xff] (!%p239_p2)   ;;  %v3398_v7 = vld [vmem:[%s4924_s1 + $0x20] ss:$16 sps:$4 sm:$0xff] (!%p239_p2)  }
   0x8   : > { %503 = vmatpush1.bf16.msra.mxu0 (!%p239_p2), %v3392_v3  ;;  %755 = vmatpush1.bf16.msra.mxu1 (!%p239_p2), %v3393_v4  ;;  %v3399_v8 = vld [vmem:[%s4924_s1 + $0xe8] ss:$16 sps:$4 sm:$0xff] (!%p239_p2)   ;;  %v3400_v9 = vld [vmem:[%s4924_s1 + $0x44] ss:$16 sps:$4 sm:$0xff] (!%p239_p2)   ;;  %v3402_v10 = vld [vmem:[%s4924_s1 + $0x10c] ss:$16 sps:$4 sm:$0xff] (!%p239_p2)  }
   0x9   : > { %504 = vmatprep.subr.bf16.mxu0 (!%p239_p2), %v3394_v5  ;;  %756 = vmatprep.subr.bf16.mxu1 (!%p239_p2), %v3396_v6  ;;  %v3404_v11 = vld [vmem:[%s4924_s1 + $0x40] ss:$16 sps:$4 sm:$0xff] (!%p239_p2)   ;;  %v3405_v12 = vld [vmem:[%s4924_s1 + $0x108] ss:$16 sps:$4 sm:$0xff] (!%p239_p2)   ;;  %v3406_v14 = vld [vmem:[%s4924_s1 + $0x64] ss:$16 sps:$4 sm:$0xff] (!%p239_p2)  }
   0xa   : > { %v3408_v15 = vld [vmem:[%s4924_s1 + $0x12c] ss:$16 sps:$4 sm:$0xff] (!%p239_p2)   ;;  %v3410_v16 = vld [vmem:[%s4924_s1 + $0x60] ss:$16 sps:$4 sm:$0xff] (!%p239_p2)   ;;  %v3907_v17 = vshrl.u32 (!%p239_p2), %v283_v13, 7  ;;  %vm498_vm2 = vcmask (!%p239_p2), 785408  }
   0xb   : > { %v3411_v18 = vld [vmem:[%s4924_s1 + $0x128] ss:$16 sps:$4 sm:$0xff] (!%p239_p2)   ;;  %v3412_v19 = vld [vmem:[%s4924_s1 + $0x84] ss:$16 sps:$4 sm:$0xff] (!%p239_p2)   ;;  %v3414_v20 = vld [vmem:[%s4924_s1 + $0x14c] ss:$16 sps:$4 sm:$0xff] (!%p239_p2)  }
   0xc   : > { %505 = vmatpush1.bf16.msra.mxu0 (!%p239_p2), %v3398_v7  ;;  %757 = vmatpush1.bf16.msra.mxu1 (!%p239_p2), %v3399_v8  ;;  %v3416_v21 = vld [vmem:[%s4924_s1 + $0x80] ss:$16 sps:$4 sm:$0xff] (!%p239_p2)   ;;  %v3417_v22 = vld [vmem:[%s4924_s1 + $0x148] ss:$16 sps:$4 sm:$0xff] (!%p239_p2)   ;;  %v290_v23 = vand.u32 (!%p239_p2), 15, %v3907_v17  ;;  %vm344_vm1 = vcmp.lt.s32.totalorder (!%p239_p2), %v3907_v17, 1 }
   0xd   : > { %s4940_s30 = smov (!%p271_p3, %s2827_s30), 3  ;;  %506 = vmatprep.subr.bf16.mxu0 %v3400_v9  ;;  %758 = vmatprep.subr.bf16.mxu1 %v3402_v10  ;;  %v3418_v24 = vld [vmem:[%s4924_s1 + $0xa4] ss:$16 sps:$4 sm:$0xff]   ;;  %v3420_v25 = vld [vmem:[%s4924_s1 + $0x16c] ss:$16 sps:$4 sm:$0xff]   ;;  %v285_v48 = vadd.s32 8, %v3907_v17 }
   0xe   : > { %s2828_s17 = sshll.u32 %s4940_s30, 3  ;;  %vm3939_vm0 = vcmp.gt.s32.totalorder %v290_v23, 0  ;;  %v3422_v30 = vld [vmem:[%s4924_s1 + $0xa0] ss:$16 sps:$4 sm:$0xff]   ;;  %v3423_v31 = vld [vmem:[%s4924_s1 + $0x168] ss:$16 sps:$4 sm:$0xff]  }
   0xf   : > { %s274_s27 = scalar_lea.vmem %s4923_s0, %s2828_s17  ;;  %v3426_v33 = vld [vmem:[%s4924_s1 + $0xc] ss:$16 sps:$4 sm:$0xff]   ;;  %v3424_v39 = vld [vmem:[%s4924_s1 + $0x8] ss:$16 sps:$4 sm:$0xff]   ;;  %v297_v53 = vand.u32 15, %v285_v48  ;;  %vm799_vm3 = vcmp.lt.s32.totalorder %v3907_v17, 7  ;;  %s280_s14 = scalar_lea.vmem %s4930_s7, %s2828_s17 }
  0x10   : > { %507 = vmatpush1.bf16.msra.mxu0 %v3404_v11  ;;  %759 = vmatpush1.bf16.msra.mxu1 %v3405_v12  ;;  %v3937_v26 = vld [vmem:[%s274_s27] sm:$0xff]  ;;  %v3943_v28 = vld [vmem:[%s274_s27 + $0x8] sm:$0xff]  ;;  %vm3809_vm5 = vmmov 1   ;;  %v3636_v27 = vld [vmem:[%s4926_s3 + $0x4d4] ss:$8 sps:$4 sm:$0xff]   ;;  %vm2763_vm8 = vcmask 392192  }
  0x11   : > { %508 = vmatprep.subr.bf16.mxu0 %v3406_v14  ;;  %760 = vmatprep.subr.bf16.mxu1 %v3408_v15  ;;  %v342_v29 = vrot.slane %v3937_v26, 7  ;;  %v343_v32 = vrot.slane %v3943_v28, 7  ;;  %v3429_v34 = vld [vmem:[%s4924_s1 + $0x18c] ss:$16 sps:$4 sm:$0xff]   ;;  %v3968_v38 = vpack.c.bf16 %v3943_v28, %v3937_v26  ;;  %v3427_v40 = vld [vmem:[%s4924_s1 + $0x188] ss:$16 sps:$4 sm:$0xff]   ;;  %vm4506_vm6 = vmpackc.low %vm3809_vm5, %vm3939_vm0 }
  0x12   : > { %v3432_v42 = vld [vmem:[%s4924_s1 + $0x2c] ss:$16 sps:$4 sm:$0xff]   ;;  %v3430_v44 = vld [vmem:[%s4924_s1 + $0x28] ss:$16 sps:$4 sm:$0xff]   ;;  %v797_v56 = vrot.slane %v3937_v26, 1  ;;  %v798_v59 = vrot.slane %v3943_v28, 1 }
  0x13   : > { %v345_v35 = vsel %vm344_vm1, %v342_v29, %v343_v32  ;;  %v346_v36 = vsel %vm344_vm1, %v343_v32, %v342_v29  ;;  %v3435_v43 = vld [vmem:[%s4924_s1 + $0x1ac] ss:$16 sps:$4 sm:$0xff]   ;;  %v3433_v45 = vld [vmem:[%s4924_s1 + $0x1a8] ss:$16 sps:$4 sm:$0xff]   ;;  %vm4042_vm4 = vcmp.lt.s32.totalorder %v297_v53, 15 }
  0x14   : > { %509 = vmatpush1.bf16.msra.mxu0 %v3410_v16  ;;  %761 = vmatpush1.bf16.msra.mxu1 %v3411_v18  ;;  %v351_v37 = vsel %vm3939_vm0, %v346_v36, 0.0  ;;  %v3438_v46 = vld [vmem:[%s4924_s1 + $0x4c] ss:$16 sps:$4 sm:$0xff]   ;;  %v3436_v49 = vld [vmem:[%s4924_s1 + $0x48] ss:$16 sps:$4 sm:$0xff]   ;;  %v801_v1 = vsel %vm799_vm3, %v798_v59, %v797_v56  ;;  %v800_v5 = vsel %vm799_vm3, %v797_v56, %v798_v59  ;;  %vm4516_vm7 = vmpackc.low %vm4042_vm4, %vm3809_vm5 }
  0x15   : > { %510 = vmatprep.subr.bf16.mxu0 %v3412_v19  ;;  %762 = vmatprep.subr.bf16.mxu1 %v3414_v20  ;;  %v3976_v41 = vpack.c.bf16 %v345_v35, %v351_v37  ;;  %v3441_v47 = vld [vmem:[%s4924_s1 + $0x1cc] ss:$16 sps:$4 sm:$0xff]   ;;  %v3439_v50 = vld [vmem:[%s4924_s1 + $0x1c8] ss:$16 sps:$4 sm:$0xff]   ;;  %v807_v6 = vsel %vm4042_vm4, %v801_v1, 0.0 }
  0x16   : > { %v3444_v51 = vld [vmem:[%s4924_s1 + $0x6c] ss:$16 sps:$4 sm:$0xff]   ;;  %v3442_v54 = vld [vmem:[%s4924_s1 + $0x68] ss:$16 sps:$4 sm:$0xff]   ;;  %v3462_v7 = vld [vmem:[%s4924_s1 + $0xc4] ss:$16 sps:$4 sm:$0xff]   ;;  %v4061_v8 = vpack.c.bf16 %v807_v6, %v800_v5 }
  0x17   : > { %v3447_v52 = vld [vmem:[%s4924_s1 + $0x1ec] ss:$16 sps:$4 sm:$0xff]   ;;  %v3445_v55 = vld [vmem:[%s4924_s1 + $0x1e8] ss:$16 sps:$4 sm:$0xff]   ;;  %v3460_v9 = vld [vmem:[%s4924_s1 + $0xc0] ss:$16 sps:$4 sm:$0xff]  }
  0x18   : > { %511 = vmatpush1.bf16.msra.mxu0 %v3416_v21  ;;  %763 = vmatpush1.bf16.msra.mxu1 %v3417_v22  ;;  %v3450_v57 = vld [vmem:[%s4924_s1 + $0x8c] ss:$16 sps:$4 sm:$0xff]   ;;  %v3448_v60 = vld [vmem:[%s4924_s1 + $0x88] ss:$16 sps:$4 sm:$0xff]   ;;  %v3465_v10 = vld [vmem:[%s4924_s1 + $0xe4] ss:$16 sps:$4 sm:$0xff]  }
  0x19   : > { %512 = vmatprep.subr.bf16.mxu0 %v3418_v24  ;;  %764 = vmatprep.subr.bf16.mxu1 %v3420_v25  ;;  %v3453_v58 = vld [vmem:[%s4924_s1 + $0x20c] ss:$16 sps:$4 sm:$0xff]   ;;  %v3451_v61 = vld [vmem:[%s4924_s1 + $0x208] ss:$16 sps:$4 sm:$0xff]   ;;  %v3463_v11 = vld [vmem:[%s4924_s1 + $0xe0] ss:$16 sps:$4 sm:$0xff]  }
  0x1a   : > { %v3456_v62 = vld [vmem:[%s4924_s1 + $0xac] ss:$16 sps:$4 sm:$0xff]   ;;  %v3454_v3 = vld [vmem:[%s4924_s1 + $0xa8] ss:$16 sps:$4 sm:$0xff]   ;;  %v3468_v12 = vld [vmem:[%s4924_s1 + $0x104] ss:$16 sps:$4 sm:$0xff]  }
  0x1b   : > { %v3459_v63 = vld [vmem:[%s4924_s1 + $0x22c] ss:$16 sps:$4 sm:$0xff]   ;;  %v3457_v4 = vld [vmem:[%s4924_s1 + $0x228] ss:$16 sps:$4 sm:$0xff]   ;;  %v3466_v13 = vld [vmem:[%s4924_s1 + $0x100] ss:$16 sps:$4 sm:$0xff]  }
  0x1c   : > { %513 = vmatpush1.bf16.msra.mxu0 %v3422_v30  ;;  %765 = vmatpush1.bf16.msra.mxu1 %v3423_v31  ;;  %v3471_v14 = vld [vmem:[%s4924_s1 + $0x124] ss:$16 sps:$4 sm:$0xff]   ;;  %v3469_v15 = vld [vmem:[%s4924_s1 + $0x120] ss:$16 sps:$4 sm:$0xff]  }
  0x1d   : > { %545 = vmatprep.subr.bf16.mxu0 %v3426_v33  ;;  %1000 = vmatprep.subr.bf16.mxu1 %v3429_v34  ;;  %v3474_v16 = vld [vmem:[%s4924_s1 + $0x144] ss:$16 sps:$4 sm:$0xff]   ;;  %v3472_v18 = vld [vmem:[%s4924_s1 + $0x140] ss:$16 sps:$4 sm:$0xff]  }
  0x1e   : > { %v3477_v19 = vld [vmem:[%s4924_s1 + $0x164] ss:$16 sps:$4 sm:$0xff]   ;;  %v3475_v20 = vld [vmem:[%s4924_s1 + $0x160] ss:$16 sps:$4 sm:$0xff]  }
  0x1f   : > { %2879 = vmatmul.mubr.msk.bf16.vlgmr.msra.gmra.mrb[0].mxu0 %vm498_vm2, %v3976_v41  ;;  %2906 = vmatmul.mubr.msk.bf16.vlgmr.msra.gmra.mrb[0].mxu1 %vm498_vm2, %v3968_v38  ;;  %v3535_v21 = vld [vmem:[%s4926_s3] ss:$8 sps:$4 sm:$0xff]   ;;  %v3480_v22 = vld [vmem:[%s4924_s1 + $0x184] ss:$16 sps:$4 sm:$0xff]  }
  0x20   : > { %546 = vmatpush1.bf16.msra.mxu0 %v3424_v39  ;;  %1001 = vmatpush1.bf16.msra.mxu1 %v3427_v40  ;;  %v3537_v23 = vld [vmem:[%s4926_s3 + $0x4] ss:$8 sps:$4 sm:$0xff]   ;;  %v3478_v24 = vld [vmem:[%s4924_s1 + $0x180] ss:$16 sps:$4 sm:$0xff]   ;;  %v3501_v37 = vld [vmem:[%s4926_s3 + $0x314] ss:$8 sps:$4 sm:$0xff]  }
  0x21   : > { %547 = vmatprep.subr.bf16.mxu0 %v3432_v42  ;;  %1002 = vmatprep.subr.bf16.mxu1 %v3435_v43  ;;  %v3483_v25 = vld [vmem:[%s4924_s1 + $0x1a4] ss:$16 sps:$4 sm:$0xff]   ;;  %v3481_v26 = vld [vmem:[%s4924_s1 + $0x1a0] ss:$16 sps:$4 sm:$0xff]  }
  0x22   : > { %577 = vmatprep.mubr.bf16.mxu0 %v3808_v2  ;;  %1032 = vmatprep.mubr.bf16.mxu1 %v3808_v2  ;;  %v3486_v28 = vld [vmem:[%s4924_s1 + $0x1c4] ss:$16 sps:$4 sm:$0xff]   ;;  %v3484_v29 = vld [vmem:[%s4924_s1 + $0x1c0] ss:$16 sps:$4 sm:$0xff]  }
  0x23   : > { %v3489_v30 = vld [vmem:[%s4924_s1 + $0x1e4] ss:$16 sps:$4 sm:$0xff]   ;;  %v3487_v31 = vld [vmem:[%s4924_s1 + $0x1e0] ss:$16 sps:$4 sm:$0xff]  }
  0x24   : > { %548 = vmatpush1.bf16.msra.mxu0 %v3430_v44  ;;  %1003 = vmatpush1.bf16.msra.mxu1 %v3433_v45  ;;  %v3492_v32 = vld [vmem:[%s4924_s1 + $0x204] ss:$16 sps:$4 sm:$0xff]   ;;  %v3493_v34 = vld [vmem:[%s4924_s1 + $0x220] ss:$16 sps:$4 sm:$0xff]  }
  0x25   : > { %549 = vmatprep.subr.bf16.mxu0 %v3438_v46  ;;  %1004 = vmatprep.subr.bf16.mxu1 %v3441_v47  ;;  %v3495_v33 = vld [vmem:[%s4924_s1 + $0x224] ss:$16 sps:$4 sm:$0xff]   ;;  %v3496_v36 = vld [vmem:[%s4926_s3 + $0x300] ss:$8 sps:$4 sm:$0xff]   ;;  %v3505_v42 = vld [vmem:[%s4926_s3 + $0x330] ss:$8 sps:$4 sm:$0xff]  }
  0x26   : > { %v3498_v35 = vld [vmem:[%s4926_s3 + $0x304] ss:$8 sps:$4 sm:$0xff]   ;;  %v3502_v40 = vld [vmem:[%s4926_s3 + $0x320] ss:$8 sps:$4 sm:$0xff]   ;;  %v3513_v45 = vld [vmem:[%s4926_s3 + $0x354] ss:$8 sps:$4 sm:$0xff]  }
  0x27   : > { %v3504_v39 = vld [vmem:[%s4926_s3 + $0x324] ss:$8 sps:$4 sm:$0xff]   ;;  %v3508_v44 = vld [vmem:[%s4926_s3 + $0x340] ss:$8 sps:$4 sm:$0xff]   ;;  %v3511_v46 = vld [vmem:[%s4926_s3 + $0x350] ss:$8 sps:$4 sm:$0xff]  }
  0x28   : > { %550 = vmatpush1.bf16.msra.mxu0 %v3436_v49  ;;  %1005 = vmatpush1.bf16.msra.mxu1 %v3439_v50  ;;  %v3510_v43 = vld [vmem:[%s4926_s3 + $0x344] ss:$8 sps:$4 sm:$0xff]   ;;  %v3514_v48 = vld [vmem:[%s4926_s3 + $0x360] ss:$8 sps:$4 sm:$0xff]   ;;  %v3519_v49 = vld [vmem:[%s4926_s3 + $0x374] ss:$8 sps:$4 sm:$0xff]  }
  0x29   : > { %551 = vmatprep.subr.bf16.mxu0 %v3444_v51  ;;  %1006 = vmatprep.subr.bf16.mxu1 %v3447_v52  ;;  %v3516_v47 = vld [vmem:[%s4926_s3 + $0x364] ss:$8 sps:$4 sm:$0xff]   ;;  %v3517_v50 = vld [vmem:[%s4926_s3 + $0x370] ss:$8 sps:$4 sm:$0xff]   ;;  %v3520_v52 = vld [vmem:[%s4926_s3 + $0x380] ss:$8 sps:$4 sm:$0xff]  }
  0x2a   : > { %v3522_v51 = vld [vmem:[%s4926_s3 + $0x384] ss:$8 sps:$4 sm:$0xff]   ;;  %v3525_v53 = vld [vmem:[%s4926_s3 + $0x394] ss:$8 sps:$4 sm:$0xff]  }
  0x2b   : > { %v3543_v56 = vld [vmem:[%s4926_s3 + $0x14] ss:$8 sps:$4 sm:$0xff]   ;;  %v3561_v6 = vld [vmem:[%s4926_s3 + $0x44] ss:$8 sps:$4 sm:$0xff]  }
  0x2c   : > { %552 = vmatpush1.bf16.msra.mxu0 %v3442_v54  ;;  %1007 = vmatpush1.bf16.msra.mxu1 %v3445_v55  ;;  %v3523_v54 = vld [vmem:[%s4926_s3 + $0x390] ss:$8 sps:$4 sm:$0xff]   ;;  %v3528_v55 = vld [vmem:[%s4926_s3 + $0x3a4] ss:$8 sps:$4 sm:$0xff]   ;;  %v3531_v59 = vld [vmem:[%s4926_s3 + $0x3b4] ss:$8 sps:$4 sm:$0xff]  }
  0x2d   : > { %553 = vmatprep.subr.bf16.mxu0 %v3450_v57  ;;  %1008 = vmatprep.subr.bf16.mxu1 %v3453_v58  ;;  %v3541_v57 = vld [vmem:[%s4926_s3 + $0x10] ss:$8 sps:$4 sm:$0xff]   ;;  %v3526_v58 = vld [vmem:[%s4926_s3 + $0x3a0] ss:$8 sps:$4 sm:$0xff]   ;;  %v3555_v1 = vld [vmem:[%s4926_s3 + $0x34] ss:$8 sps:$4 sm:$0xff]  }
  0x2e   : > { %v3540_v5 = vld [vmem:[%s4926_s3 + $0x3d4] ss:$8 sps:$4 sm:$0xff]  }
  0x2f   : > { %v3639_v0 = vld [vmem:[%s4926_s3 + $0x114] ss:$8 sps:$4 sm:$0xff]  }
  0x30   : > { %554 = vmatpush1.bf16.msra.mxu0 %v3448_v60  ;;  %1009 = vmatpush1.bf16.msra.mxu1 %v3451_v61  ;;  %v3549_v60 = vld [vmem:[%s4926_s3 + $0x24] ss:$8 sps:$4 sm:$0xff]   ;;  %v3547_v61 = vld [vmem:[%s4926_s3 + $0x20] ss:$8 sps:$4 sm:$0xff]  }
  0x31   : > { %555 = vmatprep.subr.bf16.mxu0 %v3456_v62  ;;  %1010 = vmatprep.subr.bf16.mxu1 %v3459_v63  ;;  %v3529_v62 = vld [vmem:[%s4926_s3 + $0x3b0] ss:$8 sps:$4 sm:$0xff]   ;;  %v3534_v63 = vld [vmem:[%s4926_s3 + $0x3c4] ss:$8 sps:$4 sm:$0xff]  }
  0x34   : > { %556 = vmatpush1.bf16.msra.mxu0 %v3454_v3  ;;  %1011 = vmatpush1.bf16.msra.mxu1 %v3457_v4  ;;  %v3553_v3 = vld [vmem:[%s4926_s3 + $0x30] ss:$8 sps:$4 sm:$0xff]   ;;  %v3532_v4 = vld [vmem:[%s4926_s3 + $0x3c0] ss:$8 sps:$4 sm:$0xff]  }
  0x35   : > { %711 = vmatprep.subr.bf16.mxu0 %v3462_v7  ;;  %1570 = vmatprep.subr.bf16.mxu1 %v3537_v23  ;;  %v3559_v7 = vld [vmem:[%s4926_s3 + $0x40] ss:$8 sps:$4 sm:$0xff]   ;;  %v3589_v23 = vld [vmem:[%s4926_s3 + $0x90] ss:$8 sps:$4 sm:$0xff]  }
  0x37   : > { %2880 = vmatmul.mubr.msk.bf16.vlgmr.msra.gmra.mrb[4].mxu0 %vm498_vm2, %v3976_v41  ;;  %2956 = vmatmul.mubr.msk.bf16.vlgmr.msra.gmra.mrb[0].mxu1 %vm498_vm2, %v4061_v8  ;;  %v3507_v41 = vld [vmem:[%s4926_s3 + $0x334] ss:$8 sps:$4 sm:$0xff]  }
  0x38   : > { %712 = vmatpush1.bf16.msra.mxu0 %v3460_v9  ;;  %743 = vmatprep.mubr.bf16.mxu0 %v3808_v2  ;;  %v3546_v9 = vld [vmem:[%s4926_s3 + $0x3e4] ss:$8 sps:$4 sm:$0xff]  }
  0x39   : > { %713 = vmatprep.subr.bf16.mxu0 %v3465_v10  ;;  %1571 = vmatpush1.bf16.msra.mxu1 %v3535_v21  ;;  %v3565_v10 = vld [vmem:[%s4926_s3 + $0x50] ss:$8 sps:$4 sm:$0xff]   ;;  %v3583_v21 = vld [vmem:[%s4926_s3 + $0x80] ss:$8 sps:$4 sm:$0xff]  }
  0x3a   : > { %1572 = vmatprep.subr.bf16.mxu1 %v3543_v56 }
  0x3c   : > { %714 = vmatpush1.bf16.msra.mxu0 %v3463_v11  ;;  %v3567_v11 = vld [vmem:[%s4926_s3 + $0x54] ss:$8 sps:$4 sm:$0xff]  }
  0x3d   : > { %715 = vmatprep.subr.bf16.mxu0 %v3468_v12  ;;  %1573 = vmatpush1.bf16.msra.mxu1 %v3541_v57  ;;  %v3544_v12 = vld [vmem:[%s4926_s3 + $0x3e0] ss:$8 sps:$4 sm:$0xff]  }
  0x3e   : > { %1574 = vmatprep.subr.bf16.mxu1 %v3549_v60 }
  0x40   : > { %716 = vmatpush1.bf16.msra.mxu0 %v3466_v13  ;;  %v3552_v13 = vld [vmem:[%s4926_s3 + $0x3f4] ss:$8 sps:$4 sm:$0xff]  }
  0x41   : > { %717 = vmatprep.subr.bf16.mxu0 %v3471_v14  ;;  %1575 = vmatpush1.bf16.msra.mxu1 %v3547_v61  ;;  %v3571_v14 = vld [vmem:[%s4926_s3 + $0x60] ss:$8 sps:$4 sm:$0xff]  }
  0x42   : > { %1576 = vmatprep.subr.bf16.mxu1 %v3555_v1 }
  0x44   : > { %718 = vmatpush1.bf16.msra.mxu0 %v3469_v15  ;;  %v3573_v15 = vld [vmem:[%s4926_s3 + $0x64] ss:$8 sps:$4 sm:$0xff]  }
  0x45   : > { %719 = vmatprep.subr.bf16.mxu0 %v3474_v16  ;;  %1577 = vmatpush1.bf16.msra.mxu1 %v3553_v3  ;;  %v3550_v16 = vld [vmem:[%s4926_s3 + $0x3f0] ss:$8 sps:$4 sm:$0xff]  }
  0x46   : > { %1578 = vmatprep.subr.bf16.mxu1 %v3561_v6 }
  0x48   : > { %720 = vmatpush1.bf16.msra.mxu0 %v3472_v18  ;;  %v3558_v18 = vld [vmem:[%s4926_s3 + $0x404] ss:$8 sps:$4 sm:$0xff]  }
  0x49   : > { %721 = vmatprep.subr.bf16.mxu0 %v3477_v19  ;;  %1579 = vmatpush1.bf16.msra.mxu1 %v3559_v7  ;;  %v3577_v19 = vld [vmem:[%s4926_s3 + $0x70] ss:$8 sps:$4 sm:$0xff]  }
  0x4a   : > { %1580 = vmatprep.subr.bf16.mxu1 %v3567_v11  ;;  %v3556_v11 = vld [vmem:[%s4926_s3 + $0x400] ss:$8 sps:$4 sm:$0xff]  }
  0x4c   : > { %722 = vmatpush1.bf16.msra.mxu0 %v3475_v20  ;;  %v3579_v20 = vld [vmem:[%s4926_s3 + $0x74] ss:$8 sps:$4 sm:$0xff]  }
  0x4d   : > { %957 = vmatprep.subr.bf16.mxu0 %v3480_v22  ;;  %1581 = vmatpush1.bf16.msra.mxu1 %v3565_v10  ;;  %v3585_v22 = vld [vmem:[%s4926_s3 + $0x84] ss:$8 sps:$4 sm:$0xff]  }
  0x4e   : > { %1582 = vmatprep.subr.bf16.mxu1 %v3573_v15 }
  0x4f   : > { %2905 = vmatmul.mubr.msk.bf16.vlgmr.msra.gmra.mrb[0].mxu0 %vm498_vm2, %v3968_v38  ;;  %v3499_v38 = vld [vmem:[%s4926_s3 + $0x310] ss:$8 sps:$4 sm:$0xff]  }
  0x50   : > { %958 = vmatpush1.bf16.msra.mxu0 %v3478_v24  ;;  %989 = vmatprep.mubr.bf16.mxu0 %v3808_v2  ;;  %v3490_v2 = vld [vmem:[%s4924_s1 + $0x200] ss:$16 sps:$4 sm:$0xff]   ;;  %v3591_v24 = vld [vmem:[%s4926_s3 + $0x94] ss:$8 sps:$4 sm:$0xff]  }
  0x51   : > { %959 = vmatprep.subr.bf16.mxu0 %v3483_v25  ;;  %1583 = vmatpush1.bf16.msra.mxu1 %v3571_v14  ;;  %v3595_v25 = vld [vmem:[%s4926_s3 + $0xa0] ss:$8 sps:$4 sm:$0xff]  }
  0x52   : > { %1584 = vmatprep.subr.bf16.mxu1 %v3579_v20 }
  0x54   : > { %960 = vmatpush1.bf16.msra.mxu0 %v3481_v26  ;;  %v3597_v26 = vld [vmem:[%s4926_s3 + $0xa4] ss:$8 sps:$4 sm:$0xff]  }
  0x55   : > { %961 = vmatprep.subr.bf16.mxu0 %v3486_v28  ;;  %1585 = vmatpush1.bf16.msra.mxu1 %v3577_v19  ;;  %v3601_v28 = vld [vmem:[%s4926_s3 + $0xb0] ss:$8 sps:$4 sm:$0xff]  }
  0x56   : > { %1586 = vmatprep.subr.bf16.mxu1 %v3585_v22 }
  0x58   : > { %962 = vmatpush1.bf16.msra.mxu0 %v3484_v29  ;;  %v3603_v29 = vld [vmem:[%s4926_s3 + $0xb4] ss:$8 sps:$4 sm:$0xff]  }
  0x59   : > { %963 = vmatprep.subr.bf16.mxu0 %v3489_v30  ;;  %1587 = vmatpush1.bf16.msra.mxu1 %v3583_v21  ;;  %v3607_v30 = vld [vmem:[%s4926_s3 + $0xc0] ss:$8 sps:$4 sm:$0xff]  }
  0x5a   : > { %1588 = vmatprep.subr.bf16.mxu1 %v3591_v24 }
  0x5c   : > { %964 = vmatpush1.bf16.msra.mxu0 %v3487_v31  ;;  %v3609_v31 = vld [vmem:[%s4926_s3 + $0xc4] ss:$8 sps:$4 sm:$0xff]  }
  0x5d   : > { %965 = vmatprep.subr.bf16.mxu0 %v3492_v32  ;;  %1589 = vmatpush1.bf16.msra.mxu1 %v3589_v23  ;;  %v3615_v32 = vld [vmem:[%s4926_s3 + $0xd4] ss:$8 sps:$4 sm:$0xff]  }
  0x5e   : > { %1590 = vmatprep.subr.bf16.mxu1 %v3597_v26  ;;  %v3562_v26 = vld [vmem:[%s4926_s3 + $0x410] ss:$8 sps:$4 sm:$0xff]  }
  0x60   : > { %966 = vmatpush1.bf16.msra.mxu0 %v3490_v2  ;;  %v3613_v2 = vld [vmem:[%s4926_s3 + $0xd0] ss:$8 sps:$4 sm:$0xff]  }
  0x61   : > { %967 = vmatprep.subr.bf16.mxu0 %v3495_v33  ;;  %1591 = vmatpush1.bf16.msra.mxu1 %v3595_v25  ;;  %v3621_v33 = vld [vmem:[%s4926_s3 + $0xe4] ss:$8 sps:$4 sm:$0xff]  }
  0x62   : > { %1592 = vmatprep.subr.bf16.mxu1 %v3603_v29  ;;  %v3568_v29 = vld [vmem:[%s4926_s3 + $0x420] ss:$8 sps:$4 sm:$0xff]  }
  0x64   : > { %968 = vmatpush1.bf16.msra.mxu0 %v3493_v34  ;;  %v3619_v34 = vld [vmem:[%s4926_s3 + $0xe0] ss:$8 sps:$4 sm:$0xff]  }
  0x65   : > { %2019 = vmatprep.subr.bf16.mxu0 %v3498_v35  ;;  %1593 = vmatpush1.bf16.msra.mxu1 %v3601_v28  ;;  %v3627_v35 = vld [vmem:[%s4926_s3 + $0xf4] ss:$8 sps:$4 sm:$0xff]   ;;  %v3570_v28 = vld [vmem:[%s4926_s3 + $0x424] ss:$8 sps:$4 sm:$0xff]  }
  0x66   : > { %1594 = vmatprep.subr.bf16.mxu1 %v3609_v31  ;;  %v3574_v31 = vld [vmem:[%s4926_s3 + $0x430] ss:$8 sps:$4 sm:$0xff]  }
  0x67   : > { %2955 = vmatmul.mubr.msk.bf16.vlgmr.msra.gmra.mrb[0].mxu0 %vm498_vm2, %v4061_v8  ;;  %v3538_v8 = vld [vmem:[%s4926_s3 + $0x3d0] ss:$8 sps:$4 sm:$0xff]  }
  0x68   : > { %2020 = vmatpush1.bf16.msra.mxu0 %v3496_v36  ;;  %v3625_v36 = vld [vmem:[%s4926_s3 + $0xf0] ss:$8 sps:$4 sm:$0xff]  }
  0x69   : > { %2021 = vmatprep.subr.bf16.mxu0 %v3501_v37  ;;  %1595 = vmatpush1.bf16.msra.mxu1 %v3607_v30  ;;  %v3633_v37 = vld [vmem:[%s4926_s3 + $0x104] ss:$8 sps:$4 sm:$0xff]   ;;  %v3576_v30 = vld [vmem:[%s4926_s3 + $0x434] ss:$8 sps:$4 sm:$0xff]  }
  0x6a   : > { %1596 = vmatprep.subr.bf16.mxu1 %v3615_v32  ;;  %v3582_v32 = vld [vmem:[%s4926_s3 + $0x444] ss:$8 sps:$4 sm:$0xff]  }
  0x6c   : > { %2022 = vmatpush1.bf16.msra.mxu0 %v3499_v38  ;;  %v1063_v38 = vsub.s32 2, %v3907_v17 }
  0x6d   : > { %2023 = vmatprep.subr.bf16.mxu0 %v3504_v39  ;;  %1597 = vmatpush1.bf16.msra.mxu1 %v3613_v2  ;;  %v4344_v39 = vld [vmem:[%s4925_s2] sm:$0xf] }
  0x6e   : > { %1598 = vmatprep.subr.bf16.mxu1 %v3621_v33  ;;  %v3580_v2 = vld [vmem:[%s4926_s3 + $0x440] ss:$8 sps:$4 sm:$0xff]   ;;  %v3588_v33 = vld [vmem:[%s4926_s3 + $0x454] ss:$8 sps:$4 sm:$0xff]  }
  0x70   : > { %2024 = vmatpush1.bf16.msra.mxu0 %v3502_v40  ;;  %v1067_v40 = vsub.s32 3, %v3907_v17 }
  0x71   : > { %2025 = vmatprep.subr.bf16.mxu0 %v3507_v41  ;;  %1599 = vmatpush1.bf16.msra.mxu1 %v3619_v34  ;;  %v1064_v41 = vrot.slane %v4344_v39, %v1063_v38  ;;  %v3586_v34 = vld [vmem:[%s4926_s3 + $0x450] ss:$8 sps:$4 sm:$0xff]  }
  0x72   : > { %1600 = vmatprep.subr.bf16.mxu1 %v3627_v35  ;;  %v3594_v35 = vld [vmem:[%s4926_s3 + $0x464] ss:$8 sps:$4 sm:$0xff]   ;;  %v3598_v38 = vld [vmem:[%s4926_s3 + $0x470] ss:$8 sps:$4 sm:$0xff]  }
  0x74   : > { %2026 = vmatpush1.bf16.msra.mxu0 %v3505_v42 }
  0x75   : > { %2027 = vmatprep.subr.bf16.mxu0 %v3510_v43  ;;  %1601 = vmatpush1.bf16.msra.mxu1 %v3625_v36  ;;  %v3592_v36 = vld [vmem:[%s4926_s3 + $0x460] ss:$8 sps:$4 sm:$0xff]  }
  0x76   : > { %1613 = vmatprep.subr.bf16.mxu1 %v3633_v37  ;;  %v3600_v37 = vld [vmem:[%s4926_s3 + $0x474] ss:$8 sps:$4 sm:$0xff]  }
  0x78   : > { %2028 = vmatpush1.bf16.msra.mxu0 %v3508_v44  ;;  %v1068_v44 = vrot.slane %v4344_v39, %v1067_v40  ;;  %v3606_v40 = vld [vmem:[%s4926_s3 + $0x484] ss:$8 sps:$4 sm:$0xff]  }
  0x79   : > { %2029 = vmatprep.subr.bf16.mxu0 %v3513_v45 }
  0x7c   : > { %2030 = vmatpush1.bf16.msra.mxu0 %v3511_v46 }
  0x7d   : > { %2031 = vmatprep.subr.bf16.mxu0 %v3516_v47 }
  0x80   : > { %2032 = vmatpush1.bf16.msra.mxu0 %v3514_v48 }
  0x81   : > { %2033 = vmatprep.subr.bf16.mxu0 %v3519_v49 }
  0x84   : > { %2034 = vmatpush1.bf16.msra.mxu0 %v3517_v50 }
  0x85   : > { %2035 = vmatprep.subr.bf16.mxu0 %v3522_v51 }
  0x88   : > { %2036 = vmatpush1.bf16.msra.mxu0 %v3520_v52 }
  0x89   : > { %2037 = vmatprep.subr.bf16.mxu0 %v3525_v53 }
  0x8c   : > { %2038 = vmatpush1.bf16.msra.mxu0 %v3523_v54 }
  0x8d   : > { %2039 = vmatprep.subr.bf16.mxu0 %v3528_v55 }
  0x90   : > { %2040 = vmatpush1.bf16.msra.mxu0 %v3526_v58 }
  0x91   : > { %2041 = vmatprep.subr.bf16.mxu0 %v3531_v59 }
  0x94   : > { %2042 = vmatpush1.bf16.msra.mxu0 %v3529_v62 }
  0x95   : > { %2043 = vmatprep.subr.bf16.mxu0 %v3534_v63 }
  0x98   : > { %2044 = vmatpush1.bf16.msra.mxu0 %v3532_v4 }
  0x99   : > { %2045 = vmatprep.subr.bf16.mxu0 %v3540_v5 }
  0x9c   : > { %2046 = vmatpush1.bf16.msra.mxu0 %v3538_v8 }
  0x9d   : > { %2047 = vmatprep.subr.bf16.mxu0 %v3546_v9 }
  0xa0   : > { %2048 = vmatpush1.bf16.msra.mxu0 %v3544_v12 }
  0xa1   : > { %2049 = vmatprep.subr.bf16.mxu0 %v3552_v13 }
  0xa4   : > { %2050 = vmatpush1.bf16.msra.mxu0 %v3550_v16  ;;  %v3564_v16 = vld [vmem:[%s4926_s3 + $0x414] ss:$8 sps:$4 sm:$0xff]  }
  0xa5   : > { %2475 = vmatprep.subr.bf16.mxu0 %v3558_v18 }
 0x10a   : > { %v579_v42 = vpop.f32.mrb[4].mxu0  ;;  %v1034_v43 = vpop.f32.mrb[0].mxu1 }
 0x10b   : > { %v3342_v45 = vadd.f32 %v1034_v43, %v579_v42  ;;  %v581_v46 = vpop.f32.mrb[5].mxu0  ;;  %v1036_v47 = vpop.f32.mrb[1].mxu1  ;;  %v3604_v42 = vld [vmem:[%s4926_s3 + $0x480] ss:$8 sps:$4 sm:$0xff]   ;;  %v1059_v43 = vsub.s32 1, %v3907_v17 }
 0x10c   : > { %v3343_v48 = vadd.f32 %v1036_v47, %v581_v46  ;;  %v583_v49 = vpop.f32.mrb[6].mxu0  ;;  %v1038_v50 = vpop.f32.mrb[2].mxu1  ;;  %v3610_v46 = vld [vmem:[%s4926_s3 + $0x490] ss:$8 sps:$4 sm:$0xff]  }
 0x10d   : > { %v1075_v51 = vadd.f32 %v3342_v45, %v1064_v41  ;;  %v3344_v52 = vadd.f32 %v1038_v50, %v583_v49  ;;  %v585_v53 = vpop.f32.mrb[7].mxu0  ;;  %v1040_v54 = vpop.f32.mrb[3].mxu1  ;;  %v1060_v47 = vrot.slane %v4344_v39, %v1059_v43 }
 0x10e   : > { %v1076_v55 = vadd.f32 %v3343_v48, %v1068_v44  ;;  %v3345_v56 = vadd.f32 %v1040_v54, %v585_v53  ;;  %v3618_v48 = vld [vmem:[%s4926_s3 + $0x4a4] ss:$8 sps:$4 sm:$0xff]   ;;  %v3616_v54 = vld [vmem:[%s4926_s3 + $0x4a0] ss:$8 sps:$4 sm:$0xff]  }
 0x10f   : > { %v1083_v57 = vmax.f32 %v1075_v51, 0.0  ;;  %v1079_v58 = vadd.f32 %v3344_v52, %v1064_v41  ;;  %v1055_v41 = vsub.s32 0, %v3907_v17 }
 0x110   : > { %v1084_v59 = vmax.f32 %v1076_v55, 0.0  ;;  %v1080_v60 = vadd.f32 %v3345_v56, %v1068_v44  ;;  %v3612_v44 = vld [vmem:[%s4926_s3 + $0x494] ss:$8 sps:$4 sm:$0xff]  }
 0x111   : > { %v1160_v61 = vrot.slane %v1083_v57, 7  ;;  %v2064_v62 = vrot.slane %v1083_v57, 1  ;;  %v1087_v63 = vmax.f32 %v1079_v58, 0.0  ;;  %v1056_v45 = vrot.slane %v4344_v39, %v1055_v41  ;;  %v3624_v39 = vld [vmem:[%s4926_s3 + $0x4b4] ss:$8 sps:$4 sm:$0xff]  }
 0x112   : > { %v1088_v1 = vmax.f32 %v1080_v60, 0.0  ;;  %v1161_v3 = vrot.slane %v1084_v59, 7  ;;  %v2065_v7 = vrot.slane %v1084_v59, 1 }
 0x113   : > { %v1164_v4 = vrot.slane %v1087_v63, 7  ;;  %v2068_v5 = vrot.slane %v1087_v63, 1  ;;  %v1091_v6 = vpack.c.bf16 %v1087_v63, %v1083_v57 }
 0x114   : > { %v1165_v8 = vrot.slane %v1088_v1, 7  ;;  %v2069_v9 = vrot.slane %v1088_v1, 1  ;;  %v1092_v10 = vpack.c.bf16 %v1088_v1, %v1084_v59  ;;  %v3622_v1 = vld [vmem:[%s4926_s3 + $0x4b0] ss:$8 sps:$4 sm:$0xff]  }
 0x115   : > { %v4354_v12 = vsel %vm344_vm1, %v1160_v61, %v1164_v4  ;;  %v4358_v13 = vsel %vm344_vm1, %v1164_v4, %v1160_v61  ;;  %v4362_v14 = vsel %vm799_vm3, %v2064_v62, %v2068_v5  ;;  %v4366_v15 = vsel %vm799_vm3, %v2068_v5, %v2064_v62 }
 0x116   : > { %2051 = vmatprep.mubr.bf16.mxu0 %v1092_v10  ;;  %v4373_v18 = vsel %vm344_vm1, %v1161_v3, %v1165_v8  ;;  %v4377_v19 = vsel %vm344_vm1, %v1165_v8, %v1161_v3  ;;  %v4381_v20 = vsel %vm799_vm3, %v2065_v7, %v2069_v9  ;;  %v4385_v21 = vsel %vm799_vm3, %v2069_v9, %v2065_v7  ;;  %v3630_v7 = vld [vmem:[%s4926_s3 + $0x4c4] ss:$8 sps:$4 sm:$0xff]  }
 0x117   : > { %2052 = vmatmul.mubr.bf16.vlgmr.msra.gmra.mrb[8].mxu0 %v1091_v6  ;;  %v3092_v22 = vpack.c.bf16 %v4373_v18, %v4377_v19  ;;  %v3296_v23 = vpack.c.bf16 %v4385_v21, %v4381_v20  ;;  %v3095_v24 = vpack.c.bf16 %v4354_v12, %v4358_v13  ;;  %v3299_v25 = vpack.c.bf16 %v4366_v15, %v4362_v14  ;;  %v3648_v18 = vld [vmem:[%s4926_s3 + $0x4f4] ss:$8 sps:$4 sm:$0xff]   ;;  %v3643_v19 = vld [vmem:[%s4926_s3 + $0x120] ss:$8 sps:$4 sm:$0xff]   ;;  %v3669_v20 = vld [vmem:[%s4926_s3 + $0x164] ss:$8 sps:$4 sm:$0xff]  }
 0x118   : > { %2476 = vmatpush1.bf16.msra.mxu0 %v3556_v11  ;;  %v3664_v21 = vld [vmem:[%s4926_s3 + $0x520] ss:$8 sps:$4 sm:$0xff]   ;;  %v3741_v12 = vld [vmem:[%s4926_s3 + $0x224] ss:$8 sps:$4 sm:$0xff]   ;;  %v3759_v15 = vld [vmem:[%s4926_s3 + $0x274] ss:$8 sps:$4 sm:$0xff]  }
 0x119   : > { %2477 = vmatprep.subr.bf16.mxu0 %v3564_v16  ;;  %v3736_v13 = vld [vmem:[%s4926_s3 + $0x5e0] ss:$8 sps:$4 sm:$0xff]  }
 0x11a   : > { %v3754_v14 = vld [vmem:[%s4926_s3 + $0x260] ss:$8 sps:$4 sm:$0xff]  }
 0x11c   : > { %2478 = vmatpush1.bf16.msra.mxu0 %v3562_v26 }
 0x11d   : > { %2479 = vmatprep.subr.bf16.mxu0 %v3570_v28 }
 0x120   : > { %2480 = vmatpush1.bf16.msra.mxu0 %v3568_v29 }
 0x121   : > { %2481 = vmatprep.subr.bf16.mxu0 %v3576_v30 }
 0x124   : > { %2482 = vmatpush1.bf16.msra.mxu0 %v3574_v31 }
 0x125   : > { %2483 = vmatprep.subr.bf16.mxu0 %v3582_v32  ;;  %v3628_v32 = vld [vmem:[%s4926_s3 + $0x4c0] ss:$8 sps:$4 sm:$0xff]  }
 0x128   : > { %2484 = vmatpush1.bf16.msra.mxu0 %v3580_v2 }
 0x129   : > { %2485 = vmatprep.subr.bf16.mxu0 %v3588_v33 }
 0x12c   : > { %2486 = vmatpush1.bf16.msra.mxu0 %v3586_v34  ;;  %v3745_v34 = vld [vmem:[%s4926_s3 + $0x230] ss:$8 sps:$4 sm:$0xff]  }
 0x12d   : > { %2487 = vmatprep.subr.bf16.mxu0 %v3594_v35 }
 0x130   : > { %2488 = vmatpush1.bf16.msra.mxu0 %v3592_v36 }
 0x131   : > { %2489 = vmatprep.subr.bf16.mxu0 %v3600_v37 }
 0x134   : > { %2490 = vmatpush1.bf16.msra.mxu0 %v3598_v38  ;;  %v3762_v38 = vld [vmem:[%s4926_s3 + $0x284] ss:$8 sps:$4 sm:$0xff]  }
 0x135   : > { %2491 = vmatprep.subr.bf16.mxu0 %v3606_v40  ;;  %v3631_v40 = vld [vmem:[%s4926_s3 + $0x100] ss:$8 sps:$4 sm:$0xff]  }
 0x138   : > { %2492 = vmatpush1.bf16.msra.mxu0 %v3604_v42 }
 0x139   : > { %2493 = vmatprep.subr.bf16.mxu0 %v3612_v44  ;;  %v3634_v44 = vld [vmem:[%s4926_s3 + $0x4d0] ss:$8 sps:$4 sm:$0xff]  }
 0x13a   : > { %v991_v49 = vpop.f32.mrb[0].mxu0 }
 0x13b   : > { %v1073_v50 = vadd.f32 %v1056_v45, %v991_v49  ;;  %v993_v51 = vpop.f32.mrb[1].mxu0  ;;  %v3646_v49 = vld [vmem:[%s4926_s3 + $0x4f0] ss:$8 sps:$4 sm:$0xff]  }
 0x13c   : > { %v1074_v52 = vadd.f32 %v1060_v47, %v993_v51  ;;  %2494 = vmatpush1.bf16.msra.mxu0 %v3610_v46  ;;  %v995_v53 = vpop.f32.mrb[2].mxu0  ;;  %v3637_v46 = vld [vmem:[%s4926_s3 + $0x110] ss:$8 sps:$4 sm:$0xff]  }
 0x13d   : > { %v4460_v55 = vmax.f32 %v1073_v50, 0.0  ;;  %v1077_v56 = vadd.f32 %v1056_v45, %v995_v53  ;;  %v997_v57 = vpop.f32.mrb[3].mxu0  ;;  %2495 = vmatprep.subr.bf16.mxu0 %v3618_v48  ;;  %v3642_v45 = vld [vmem:[%s4926_s3 + $0x4e4] ss:$8 sps:$4 sm:$0xff]   ;;  %v3640_v48 = vld [vmem:[%s4926_s3 + $0x4e0] ss:$8 sps:$4 sm:$0xff]  }
 0x13e   : > { %v4465_v58 = vmax.f32 %v1074_v52, 0.0  ;;  %v1078_v59 = vadd.f32 %v1060_v47, %v997_v57  ;;  %v3645_v47 = vld [vmem:[%s4926_s3 + $0x124] ss:$8 sps:$4 sm:$0xff]   ;;  %v3649_v51 = vld [vmem:[%s4926_s3 + $0x130] ss:$8 sps:$4 sm:$0xff]  }
 0x13f   : > { %v4467_v60 = vmax.f32 %v1077_v56, 0.0  ;;  %v1158_v61 = vrot.slane %v4460_v55, 7  ;;  %v2062_v62 = vrot.slane %v4460_v55, 1  ;;  %v3654_v50 = vld [vmem:[%s4926_s3 + $0x504] ss:$8 sps:$4 sm:$0xff]  }
 0x140   : > { %v4471_v63 = vmax.f32 %v1078_v59, 0.0  ;;  %2496 = vmatpush1.bf16.msra.mxu0 %v3616_v54  ;;  %v1159_v3 = vrot.slane %v4465_v58, 7  ;;  %v2063_v8 = vrot.slane %v4465_v58, 1  ;;  %v3657_v52 = vld [vmem:[%s4926_s3 + $0x144] ss:$8 sps:$4 sm:$0xff]  }
 0x141   : > { %v1089_v4 = vpack.c.bf16 %v4467_v60, %v4460_v55  ;;  %v1162_v5 = vrot.slane %v4467_v60, 7  ;;  %v2066_v6 = vrot.slane %v4467_v60, 1  ;;  %2497 = vmatprep.subr.bf16.mxu0 %v3624_v39  ;;  %v3652_v53 = vld [vmem:[%s4926_s3 + $0x500] ss:$8 sps:$4 sm:$0xff]   ;;  %v3660_v54 = vld [vmem:[%s4926_s3 + $0x514] ss:$8 sps:$4 sm:$0xff]  }
 0x142   : > { %v1163_v9 = vrot.slane %v4471_v63, 7  ;;  %v2067_v10 = vrot.slane %v4471_v63, 1  ;;  %v1090_v11 = vpack.c.bf16 %v4471_v63, %v4465_v58  ;;  %v3655_v56 = vld [vmem:[%s4926_s3 + $0x140] ss:$8 sps:$4 sm:$0xff]   ;;  %v3663_v57 = vld [vmem:[%s4926_s3 + $0x154] ss:$8 sps:$4 sm:$0xff]  }
 0x143   : > { %v1166_v16 = vsel %vm344_vm1, %v1158_v61, %v1162_v5  ;;  %v1170_v26 = vsel %vm344_vm1, %v1162_v5, %v1158_v61  ;;  %v2070_v28 = vsel %vm799_vm3, %v2062_v62, %v2066_v6  ;;  %v2074_v29 = vsel %vm799_vm3, %v2066_v6, %v2062_v62  ;;  %v3658_v39 = vld [vmem:[%s4926_s3 + $0x510] ss:$8 sps:$4 sm:$0xff]   ;;  %v3666_v59 = vld [vmem:[%s4926_s3 + $0x524] ss:$8 sps:$4 sm:$0xff]   ;;  %v3667_v62 = vld [vmem:[%s4926_s3 + $0x160] ss:$8 sps:$4 sm:$0xff]  }
 0x144   : > { %v3089_v30 = vpack.c.bf16 %v1166_v16, %v1170_v26  ;;  %v3293_v31 = vpack.c.bf16 %v2074_v29, %v2070_v28  ;;  %2498 = vmatpush1.bf16.msra.mxu0 %v3622_v1  ;;  %v1167_v2 = vsel %vm344_vm1, %v1159_v3, %v1163_v9  ;;  %v1171_v33 = vsel %vm344_vm1, %v1163_v9, %v1159_v3  ;;  %v3661_v61 = vld [vmem:[%s4926_s3 + $0x150] ss:$8 sps:$4 sm:$0xff]   ;;  %v3675_v1 = vld [vmem:[%s4926_s3 + $0x174] ss:$8 sps:$4 sm:$0xff]   ;;  %v3678_v5 = vld [vmem:[%s4926_s3 + $0x544] ss:$8 sps:$4 sm:$0xff]  }
 0x145   : > { %2499 = vmatprep.subr.bf16.mxu0 %v3630_v7  ;;  %v3086_v35 = vpack.c.bf16 %v1167_v2, %v1171_v33  ;;  %v2071_v36 = vsel %vm799_vm3, %v2063_v8, %v2067_v10  ;;  %v2075_v37 = vsel %vm799_vm3, %v2067_v10, %v2063_v8  ;;  %v3670_v3 = vld [vmem:[%s4926_s3 + $0x530] ss:$8 sps:$4 sm:$0xff]   ;;  %v3681_v7 = vld [vmem:[%s4926_s3 + $0x184] ss:$8 sps:$4 sm:$0xff]   ;;  %v3676_v8 = vld [vmem:[%s4926_s3 + $0x540] ss:$8 sps:$4 sm:$0xff]  }
 0x146   : > { %v3290_v42 = vpack.c.bf16 %v2075_v37, %v2071_v36  ;;  %v3673_v6 = vld [vmem:[%s4926_s3 + $0x170] ss:$8 sps:$4 sm:$0xff]   ;;  %v3684_v9 = vld [vmem:[%s4926_s3 + $0x554] ss:$8 sps:$4 sm:$0xff]   ;;  %v3679_v10 = vld [vmem:[%s4926_s3 + $0x180] ss:$8 sps:$4 sm:$0xff]  }
 0x147   : > { %3087 = vmatprep.mubr.msk.bf16.mxu1 %vm4506_vm6, %v3086_v35  ;;  %v3687_v16 = vld [vmem:[%s4926_s3 + $0x194] ss:$8 sps:$4 sm:$0xff]   ;;  %v3682_v26 = vld [vmem:[%s4926_s3 + $0x550] ss:$8 sps:$4 sm:$0xff]   ;;  %v3690_v28 = vld [vmem:[%s4926_s3 + $0x564] ss:$8 sps:$4 sm:$0xff]  }
 0x148   : > { %2500 = vmatpush1.bf16.msra.mxu0 %v3628_v32  ;;  %3291 = vmatprep.mubr.msk.bf16.mxu0 %vm4516_vm7, %v3290_v42  ;;  %v3685_v29 = vld [vmem:[%s4926_s3 + $0x190] ss:$8 sps:$4 sm:$0xff]   ;;  %v3696_v32 = vld [vmem:[%s4926_s3 + $0x574] ss:$8 sps:$4 sm:$0xff]   ;;  %v3691_v2 = vld [vmem:[%s4926_s3 + $0x1a0] ss:$8 sps:$4 sm:$0xff]  }
 0x149   : > { %3090 = vmatmul.mubr.msk.bf16.vlgmr.msra.gmra.mrb[4].mxu1 %vm4506_vm6, %v3089_v30  ;;  %2501 = vmatprep.subr.bf16.mxu0 %v3636_v27  ;;  %v3693_v30 = vld [vmem:[%s4926_s3 + $0x1a4] ss:$8 sps:$4 sm:$0xff]   ;;  %v3699_v33 = vld [vmem:[%s4926_s3 + $0x1b4] ss:$8 sps:$4 sm:$0xff]   ;;  %v3694_v35 = vld [vmem:[%s4926_s3 + $0x570] ss:$8 sps:$4 sm:$0xff]  }
 0x14a   : > { %1614 = vmatpush1.bf16.msra.mxu1 %v3631_v40  ;;  %3093 = vmatprep.mubr.msk.bf16.mxu1 %vm4506_vm6, %v3092_v22  ;;  %v3651_v22 = vld [vmem:[%s4926_s3 + $0x134] ss:$8 sps:$4 sm:$0xff]   ;;  %v3702_v36 = vld [vmem:[%s4926_s3 + $0x584] ss:$8 sps:$4 sm:$0xff]   ;;  %v3697_v37 = vld [vmem:[%s4926_s3 + $0x1b0] ss:$8 sps:$4 sm:$0xff]  }
 0x14b   : > { %1615 = vmatprep.subr.bf16.mxu1 %v3639_v0  ;;  %v3705_v27 = vld [vmem:[%s4926_s3 + $0x1c4] ss:$8 sps:$4 sm:$0xff]   ;;  %v3700_v40 = vld [vmem:[%s4926_s3 + $0x580] ss:$8 sps:$4 sm:$0xff]   ;;  %v3708_v42 = vld [vmem:[%s4926_s3 + $0x594] ss:$8 sps:$4 sm:$0xff]  }
 0x14c   : > { %2502 = vmatpush1.bf16.msra.mxu0 %v3634_v44  ;;  %v3703_v0 = vld [vmem:[%s4926_s3 + $0x1c0] ss:$8 sps:$4 sm:$0xff]   ;;  %v3711_v44 = vld [vmem:[%s4926_s3 + $0x1d4] ss:$8 sps:$4 sm:$0xff]  }
 0x14d   : > { %2503 = vmatprep.subr.bf16.mxu0 %v3642_v45  ;;  %v3706_v45 = vld [vmem:[%s4926_s3 + $0x590] ss:$8 sps:$4 sm:$0xff]   ;;  %v3739_v58 = vld [vmem:[%s4926_s3 + $0x220] ss:$8 sps:$4 sm:$0xff]   ;;  %v3747_v63 = vld [vmem:[%s4926_s3 + $0x234] ss:$8 sps:$4 sm:$0xff]  }
 0x14e   : > { %1616 = vmatpush1.bf16.msra.mxu1 %v3637_v46  ;;  %v3714_v46 = vld [vmem:[%s4926_s3 + $0x5a4] ss:$8 sps:$4 sm:$0xff]   ;;  %v3788_v55 = vld [vmem:[%s4928_s5 + $0x50] sm:$0xff]  }
 0x14f   : > { %1617 = vmatprep.subr.bf16.mxu1 %v3645_v47  ;;  %v3709_v47 = vld [vmem:[%s4926_s3 + $0x1d0] ss:$8 sps:$4 sm:$0xff]  }
 0x150   : > { %2504 = vmatpush1.bf16.msra.mxu0 %v3640_v48  ;;  %v3717_v48 = vld [vmem:[%s4926_s3 + $0x1e4] ss:$8 sps:$4 sm:$0xff]   ;;  %v3789_v60 = vld [vmem:[%s4928_s5 + $0x10] sm:$0xff]  }
 0x151   : > { %2505 = vmatprep.subr.bf16.mxu0 %v3648_v18  ;;  %v3712_v18 = vld [vmem:[%s4926_s3 + $0x5a0] ss:$8 sps:$4 sm:$0xff]  }
 0x152   : > { %1618 = vmatpush1.bf16.msra.mxu1 %v3643_v19  ;;  %v3720_v19 = vld [vmem:[%s4926_s3 + $0x5b4] ss:$8 sps:$4 sm:$0xff]  }
 0x153   : > { %1619 = vmatprep.subr.bf16.mxu1 %v3651_v22  ;;  %v3715_v22 = vld [vmem:[%s4926_s3 + $0x1e0] ss:$8 sps:$4 sm:$0xff]  }
 0x154   : > { %2506 = vmatpush1.bf16.msra.mxu0 %v3646_v49  ;;  %v3723_v49 = vld [vmem:[%s4926_s3 + $0x1f4] ss:$8 sps:$4 sm:$0xff]  }
 0x155   : > { %2518 = vmatprep.subr.bf16.mxu0 %v3654_v50  ;;  %v3718_v50 = vld [vmem:[%s4926_s3 + $0x5b0] ss:$8 sps:$4 sm:$0xff]  }
 0x156   : > { %1620 = vmatpush1.bf16.msra.mxu1 %v3649_v51  ;;  %v3726_v51 = vld [vmem:[%s4926_s3 + $0x5c4] ss:$8 sps:$4 sm:$0xff]  }
 0x157   : > { %3294 = vmatmul.mubr.msk.bf16.vlgmr.msra.gmra.mrb[8].mxu0 %vm4516_vm7, %v3293_v31  ;;  %1621 = vmatprep.subr.bf16.mxu1 %v3657_v52  ;;  %v3688_v31 = vld [vmem:[%s4926_s3 + $0x560] ss:$8 sps:$4 sm:$0xff]   ;;  %v3721_v52 = vld [vmem:[%s4926_s3 + $0x1f0] ss:$8 sps:$4 sm:$0xff]  }
 0x158   : > { %2519 = vmatpush1.bf16.msra.mxu0 %v3652_v53  ;;  %3297 = vmatprep.mubr.msk.bf16.mxu0 %vm4516_vm7, %v3296_v23  ;;  %v3672_v23 = vld [vmem:[%s4926_s3 + $0x534] ss:$8 sps:$4 sm:$0xff]   ;;  %v3729_v53 = vld [vmem:[%s4926_s3 + $0x204] ss:$8 sps:$4 sm:$0xff]  }
 0x159   : > { %2520 = vmatprep.subr.bf16.mxu0 %v3660_v54  ;;  %v3724_v54 = vld [vmem:[%s4926_s3 + $0x5c0] ss:$8 sps:$4 sm:$0xff]  }
 0x15a   : > { %1622 = vmatpush1.bf16.msra.mxu1 %v3655_v56  ;;  %v3732_v56 = vld [vmem:[%s4926_s3 + $0x5d4] ss:$8 sps:$4 sm:$0xff]  }
 0x15b   : > { %1623 = vmatprep.subr.bf16.mxu1 %v3663_v57  ;;  %v3727_v57 = vld [vmem:[%s4926_s3 + $0x200] ss:$8 sps:$4 sm:$0xff]  }
 0x15c   : > { %2521 = vmatpush1.bf16.msra.mxu0 %v3658_v39  ;;  %v3735_v39 = vld [vmem:[%s4926_s3 + $0x214] ss:$8 sps:$4 sm:$0xff]  }
 0x15d   : > { %2522 = vmatprep.subr.bf16.mxu0 %v3666_v59  ;;  %v3730_v59 = vld [vmem:[%s4926_s3 + $0x5d0] ss:$8 sps:$4 sm:$0xff]  }
 0x15e   : > { %1624 = vmatpush1.bf16.msra.mxu1 %v3661_v61  ;;  %v3738_v61 = vld [vmem:[%s4926_s3 + $0x5e4] ss:$8 sps:$4 sm:$0xff]  }
 0x15f   : > { %1625 = vmatprep.subr.bf16.mxu1 %v3669_v20  ;;  %v3733_v20 = vld [vmem:[%s4926_s3 + $0x210] ss:$8 sps:$4 sm:$0xff]  }
 0x160   : > { %2523 = vmatpush1.bf16.msra.mxu0 %v3664_v21  ;;  %v3750_v21 = vld [vmem:[%s4926_s3 + $0x244] ss:$8 sps:$4 sm:$0xff]  }
 0x161   : > { %2524 = vmatprep.subr.bf16.mxu0 %v3672_v23  ;;  %v3748_v23 = vld [vmem:[%s4926_s3 + $0x240] ss:$8 sps:$4 sm:$0xff]  }
 0x162   : > { %1626 = vmatpush1.bf16.msra.mxu1 %v3667_v62  ;;  %v3753_v62 = vld [vmem:[%s4926_s3 + $0x254] ss:$8 sps:$4 sm:$0xff]  }
 0x163   : > { %1627 = vmatprep.subr.bf16.mxu1 %v3675_v1  ;;  %v3751_v1 = vld [vmem:[%s4926_s3 + $0x250] ss:$8 sps:$4 sm:$0xff]  }
 0x164   : > { %2525 = vmatpush1.bf16.msra.mxu0 %v3670_v3  ;;  %v3756_v3 = vld [vmem:[%s4926_s3 + $0x264] ss:$8 sps:$4 sm:$0xff]  }
 0x165   : > { %2526 = vmatprep.subr.bf16.mxu0 %v3678_v5  ;;  %v3760_v5 = vld [vmem:[%s4926_s3 + $0x280] ss:$8 sps:$4 sm:$0xff]  }
 0x166   : > { %1628 = vmatpush1.bf16.msra.mxu1 %v3673_v6  ;;  %v3765_v6 = vld [vmem:[%s4926_s3 + $0x294] ss:$8 sps:$4 sm:$0xff]  }
 0x167   : > { %1629 = vmatprep.subr.bf16.mxu1 %v3681_v7  ;;  %v3763_v7 = vld [vmem:[%s4926_s3 + $0x290] ss:$8 sps:$4 sm:$0xff]  }
 0x168   : > { %2527 = vmatpush1.bf16.msra.mxu0 %v3676_v8  ;;  %v3768_v8 = vld [vmem:[%s4926_s3 + $0x2a4] ss:$8 sps:$4 sm:$0xff]  }
 0x169   : > { %2528 = vmatprep.subr.bf16.mxu0 %v3684_v9  ;;  %v3766_v9 = vld [vmem:[%s4926_s3 + $0x2a0] ss:$8 sps:$4 sm:$0xff]  }
 0x16a   : > { %1630 = vmatpush1.bf16.msra.mxu1 %v3679_v10  ;;  %v3771_v10 = vld [vmem:[%s4926_s3 + $0x2b4] ss:$8 sps:$4 sm:$0xff]  }
 0x16b   : > { %1631 = vmatprep.subr.bf16.mxu1 %v3687_v16  ;;  %v3769_v16 = vld [vmem:[%s4926_s3 + $0x2b0] ss:$8 sps:$4 sm:$0xff]  }
 0x16c   : > { %2529 = vmatpush1.bf16.msra.mxu0 %v3682_v26  ;;  %v3774_v26 = vld [vmem:[%s4926_s3 + $0x2c4] ss:$8 sps:$4 sm:$0xff]  }
 0x16d   : > { %2530 = vmatprep.subr.bf16.mxu0 %v3690_v28  ;;  %v3772_v28 = vld [vmem:[%s4926_s3 + $0x2c0] ss:$8 sps:$4 sm:$0xff]  }
 0x16e   : > { %1632 = vmatpush1.bf16.msra.mxu1 %v3685_v29  ;;  %v3777_v29 = vld [vmem:[%s4926_s3 + $0x2d4] ss:$8 sps:$4 sm:$0xff]  }
 0x16f   : > { %1633 = vmatprep.subr.bf16.mxu1 %v3693_v30  ;;  %v3775_v30 = vld [vmem:[%s4926_s3 + $0x2d0] ss:$8 sps:$4 sm:$0xff]  }
 0x170   : > { %2531 = vmatpush1.bf16.msra.mxu0 %v3688_v31  ;;  %v3780_v31 = vld [vmem:[%s4926_s3 + $0x2e4] ss:$8 sps:$4 sm:$0xff]  }
 0x171   : > { %2532 = vmatprep.subr.bf16.mxu0 %v3696_v32  ;;  %v3778_v32 = vld [vmem:[%s4926_s3 + $0x2e0] ss:$8 sps:$4 sm:$0xff]  }
 0x172   : > { %1634 = vmatpush1.bf16.msra.mxu1 %v3691_v2  ;;  %v3783_v2 = vld [vmem:[%s4926_s3 + $0x2f4] ss:$8 sps:$4 sm:$0xff]  }
 0x173   : > { %1635 = vmatprep.subr.bf16.mxu1 %v3699_v33  ;;  %v3781_v33 = vld [vmem:[%s4926_s3 + $0x2f0] ss:$8 sps:$4 sm:$0xff]  }
 0x174   : > { %2533 = vmatpush1.bf16.msra.mxu0 %v3694_v35  ;;  %v3784_v35 = vld [vmem:[%s4928_s5 + $0x40] sm:$0xff]  }
 0x175   : > { %2534 = vmatprep.subr.bf16.mxu0 %v3702_v36  ;;  %v3785_v36 = vld [vmem:[%s4928_s5] sm:$0xff]  }
 0x176   : > { %1636 = vmatpush1.bf16.msra.mxu1 %v3697_v37  ;;  %v3786_v37 = vld [vmem:[%s4928_s5 + $0x48] sm:$0xff]  }
 0x177   : > { %1637 = vmatprep.subr.bf16.mxu1 %v3705_v27  ;;  %v3787_v27 = vld [vmem:[%s4928_s5 + $0x8] sm:$0xff]  }
 0x178   : > { %2535 = vmatpush1.bf16.msra.mxu0 %v3700_v40  ;;  %v3791_v40 = vld [vmem:[%s4928_s5 + $0x18] sm:$0xff]  }
 0x179   : > { %2536 = vmatprep.subr.bf16.mxu0 %v3708_v42  ;;  %v3792_v42 = vld [vmem:[%s4928_s5 + $0x60] sm:$0xff]  }
 0x17a   : > { %1638 = vmatpush1.bf16.msra.mxu1 %v3703_v0  ;;  %v3793_v0 = vld [vmem:[%s4928_s5 + $0x20] sm:$0xff]  }
 0x17b   : > { %1639 = vmatprep.subr.bf16.mxu1 %v3711_v44  ;;  %v3794_v44 = vld [vmem:[%s4928_s5 + $0x68] sm:$0xff]  }
 0x17c   : > { %2537 = vmatpush1.bf16.msra.mxu0 %v3706_v45  ;;  %v3795_v45 = vld [vmem:[%s4928_s5 + $0x28] sm:$0xff]  }
 0x17d   : > { %2538 = vmatprep.subr.bf16.mxu0 %v3714_v46  ;;  %v3796_v46 = vld [vmem:[%s4928_s5 + $0x70] sm:$0xff]  }
 0x17e   : > { %1640 = vmatpush1.bf16.msra.mxu1 %v3709_v47  ;;  %v3797_v47 = vld [vmem:[%s4928_s5 + $0x30] sm:$0xff]  }
 0x17f   : > { %1641 = vmatprep.subr.bf16.mxu1 %v3717_v48  ;;  %v3798_v48 = vld [vmem:[%s4928_s5 + $0x78] sm:$0xff]  }
 0x180   : > { %2539 = vmatpush1.bf16.msra.mxu0 %v3712_v18  ;;  %v3799_v18 = vld [vmem:[%s4928_s5 + $0x38] sm:$0xff]  }
 0x181   : > { %2540 = vmatprep.subr.bf16.mxu0 %v3720_v19 }
 0x182   : > { %1642 = vmatpush1.bf16.msra.mxu1 %v3715_v22 }
 0x183   : > { %1643 = vmatprep.subr.bf16.mxu1 %v3723_v49 }
 0x184   : > { %2541 = vmatpush1.bf16.msra.mxu0 %v3718_v50 }
 0x185   : > { %2542 = vmatprep.subr.bf16.mxu0 %v3726_v51  ;;  %v2565_v51 = vld [vmem:[%s4927_s4] sm:$0x3] }
 0x186   : > { %1644 = vmatpush1.bf16.msra.mxu1 %v3721_v52  ;;  %v2570_v52 = vrot.slane %v2565_v51, %v1055_v41 }
 0x187   : > { %1976 = vmatprep.subr.bf16.mxu1 %v3729_v53 }
 0x188   : > { %2543 = vmatpush1.bf16.msra.mxu0 %v3724_v54  ;;  %v2574_v54 = vrot.slane %v2565_v51, %v1059_v43  ;;  %v3301_v43 = vld [vmem:[%s4929_s6] ss:$0 sm:$0xff] }
 0x189   : > { %3096 = vmatmul.mubr.msk.bf16.vlgmr.msra.gmra.mrb[4].mxu1 %vm4506_vm6, %v3095_v24  ;;  %2544 = vmatprep.subr.bf16.mxu0 %v3732_v56  ;;  %v3744_v24 = vld [vmem:[%s4926_s3 + $0x5f4] ss:$8 sps:$4 sm:$0xff]  }
 0x18a   : > { %1977 = vmatpush1.bf16.msra.mxu1 %v3727_v57  ;;  %2008 = vmatprep.mubr.bf16.mxu1 %v1090_v11  ;;  %v3742_v11 = vld [vmem:[%s4926_s3 + $0x5f0] ss:$8 sps:$4 sm:$0xff]  }
 0x18b   : > { %1978 = vmatprep.subr.bf16.mxu1 %v3735_v39 }
 0x18c   : > { %2545 = vmatpush1.bf16.msra.mxu0 %v3730_v59 }
 0x18d   : > { %2546 = vmatprep.subr.bf16.mxu0 %v3738_v61 }
 0x18e   : > { %1979 = vmatpush1.bf16.msra.mxu1 %v3733_v20 }
 0x18f   : > { %1980 = vmatprep.subr.bf16.mxu1 %v3741_v12 }
 0x190   : > { %2547 = vmatpush1.bf16.msra.mxu0 %v3736_v13 }
 0x191   : > { %2548 = vmatprep.subr.bf16.mxu0 %v3744_v24 }
 0x192   : > { %1981 = vmatpush1.bf16.msra.mxu1 %v3739_v58 }
 0x193   : > { %1982 = vmatprep.subr.bf16.mxu1 %v3747_v63 }
 0x194   : > { %2549 = vmatpush1.bf16.msra.mxu0 %v3742_v11 }
 0x196   : > { %1983 = vmatpush1.bf16.msra.mxu1 %v3745_v34 }
 0x197   : > { %3300 = vmatmul.mubr.msk.bf16.vlgmr.msra.gmra.mrb[8].mxu0 %vm4516_vm7, %v3299_v25  ;;  %1984 = vmatprep.subr.bf16.mxu1 %v3750_v21  ;;  %v3757_v25 = vld [vmem:[%s4926_s3 + $0x270] ss:$8 sps:$4 sm:$0xff]  }
 0x19a   : > { %1985 = vmatpush1.bf16.msra.mxu1 %v3748_v23 }
 0x19b   : > { %1986 = vmatprep.subr.bf16.mxu1 %v3753_v62 }
 0x19e   : > { %1987 = vmatpush1.bf16.msra.mxu1 %v3751_v1 }
 0x19f   : > { %1988 = vmatprep.subr.bf16.mxu1 %v3756_v3 }
 0x1a2   : > { %1989 = vmatpush1.bf16.msra.mxu1 %v3754_v14 }
 0x1a3   : > { %1990 = vmatprep.subr.bf16.mxu1 %v3759_v15 }
 0x1a6   : > { %1991 = vmatpush1.bf16.msra.mxu1 %v3757_v25 }
 0x1a7   : > { %1992 = vmatprep.subr.bf16.mxu1 %v3762_v38 }
 0x1aa   : > { %1993 = vmatpush1.bf16.msra.mxu1 %v3760_v5 }
 0x1ab   : > { %1994 = vmatprep.subr.bf16.mxu1 %v3765_v6 }
 0x1ae   : > { %1995 = vmatpush1.bf16.msra.mxu1 %v3763_v7 }
 0x1af   : > { %1996 = vmatprep.subr.bf16.mxu1 %v3768_v8 }
 0x1b2   : > { %1997 = vmatpush1.bf16.msra.mxu1 %v3766_v9 }
 0x1b3   : > { %1998 = vmatprep.subr.bf16.mxu1 %v3771_v10 }
 0x1b6   : > { %1999 = vmatpush1.bf16.msra.mxu1 %v3769_v16 }
 0x1b7   : > { %2000 = vmatprep.subr.bf16.mxu1 %v3774_v26 }
 0x1ba   : > { %2001 = vmatpush1.bf16.msra.mxu1 %v3772_v28 }
 0x1bb   : > { %2002 = vmatprep.subr.bf16.mxu1 %v3777_v29 }
 0x1be   : > { %2003 = vmatpush1.bf16.msra.mxu1 %v3775_v30 }
 0x1bf   : > { %2004 = vmatprep.subr.bf16.mxu1 %v3780_v31 }
 0x1c2   : > { %2005 = vmatpush1.bf16.msra.mxu1 %v3778_v32 }
 0x1c3   : > { %2006 = vmatprep.subr.bf16.mxu1 %v3783_v2 }
 0x1c6   : > { %2007 = vmatpush1.bf16.msra.mxu1 %v3781_v33 }
 0x1c7   : > { %3320 = vmatprep.subr.bf16.mxu1 %v3784_v35 }
 0x1c9   : > { %2009 = vmatmul.mubr.bf16.vlgmr.msra.gmra.mrb[4].mxu1 %v1089_v4  ;;  %v3790_v4 = vld [vmem:[%s4928_s5 + $0x58] sm:$0xff]  }
 0x1ca   : > { %3321 = vmatpush3.bf16.msra.mxu1 %v3785_v36 }
 0x1cb   : > { %3322 = vmatprep.subr.bf16.mxu1 %v3786_v37 }
 0x1ce   : > { %3323 = vmatpush3.bf16.msra.mxu1 %v3787_v27 }
 0x1cf   : > { %3324 = vmatprep.subr.bf16.mxu1 %v3788_v55 }
 0x1d2   : > { %3325 = vmatpush3.bf16.msra.mxu1 %v3789_v60 }
 0x1d3   : > { %3326 = vmatprep.subr.bf16.mxu1 %v3790_v4 }
 0x1d6   : > { %3327 = vmatpush3.bf16.msra.mxu1 %v3791_v40 }
 0x1d7   : > { %3328 = vmatprep.subr.bf16.mxu1 %v3792_v42 }
 0x1da   : > { %3329 = vmatpush3.bf16.msra.mxu1 %v3793_v0 }
 0x1db   : > { %3330 = vmatprep.subr.bf16.mxu1 %v3794_v44 }
 0x1de   : > { %3331 = vmatpush3.bf16.msra.mxu1 %v3795_v45 }
 0x1df   : > { %3332 = vmatprep.subr.bf16.mxu1 %v3796_v46 }
 0x1e2   : > { %3333 = vmatpush3.bf16.msra.mxu1 %v3797_v47 }
 0x1e3   : > { %3334 = vmatprep.subr.bf16.mxu1 %v3798_v48 }
 0x1e6   : > { %3335 = vmatpush3.bf16.msra.mxu1 %v3799_v18 }
 0x26a   : > { %v2552_v19 = vpop.f32.mrb[8].mxu0 }
 0x26b   : > { %v2554_v22 = vpop.f32.mrb[9].mxu0 }
 0x26c   : > { %v2556_v49 = vpop.f32.mrb[10].mxu0 }
 0x26d   : > { %v2558_v50 = vpop.f32.mrb[11].mxu0 }
 0x29c   : > { %v2010_v53 = vpop.f32.mrb[4].mxu1 }
 0x29d   : > { %v3346_v56 = vadd.f32 %v2552_v19, %v2010_v53  ;;  %v2012_v57 = vpop.f32.mrb[5].mxu1 }
 0x29e   : > { %v3347_v39 = vadd.f32 %v2554_v22, %v2012_v57  ;;  %v2014_v59 = vpop.f32.mrb[6].mxu1 }
 0x29f   : > { %v2577_v61 = vadd.f32 %v3346_v56, %v2570_v52  ;;  %v3348_v20 = vadd.f32 %v2556_v49, %v2014_v59  ;;  %v2016_v12 = vpop.f32.mrb[7].mxu1 }
 0x2a0   : > { %v2578_v13 = vadd.f32 %v3347_v39, %v2574_v54  ;;  %v3349_v24 = vadd.f32 %v2558_v50, %v2016_v12 }
 0x2a1   : > { %v2579_v58 = vadd.f32 %v3348_v20, %v2570_v52  ;;  %v2581_v11 = vmax.f32 %v2577_v61, 0.0 }
 0x2a2   : > { %v2580_v63 = vadd.f32 %v3349_v24, %v2574_v54  ;;  %v2582_v21 = vmax.f32 %v2578_v13, 0.0 }
 0x2a3   : > { %v2583_v34 = vmax.f32 %v2579_v58, 0.0 }
 0x2a4   : > { %v2584_v41 = vmax.f32 %v2580_v63, 0.0 }
 0x2a5   : > { %v2585_v23 = vpack.c.bf16 %v2583_v34, %v2581_v11 }
 0x2a6   : > { %v2586_v62 = vpack.c.bf16 %v2584_v41, %v2582_v21 }
 0x2a8   : > { %2754 = vmatprep.mubr.bf16.mxu1 %v2586_v62 }
 0x2a9   : > { %2755 = vmatmul.mubr.bf16.vlgmr.msra.gmra.mrb[8].mxu1 %v2585_v23 }
 0x37c   : > { %v3336_v17 = vpop.f32.mrb[8].mxu1 }
 0x37d   : > { %v3337_v1 = vpop.f32.mrb[9].mxu1 }
 0x37e   : > { %v3338_v3 = vadd.f32 %v3337_v1, %v3336_v17  ;;  %v3339_v14 = vpop.f32.mrb[10].mxu1 }
 0x37f   : > { %v3340_v15 = vpop.f32.mrb[11].mxu1 }
 0x380   : > { %v2757_v25 = vadd.f32 %v3338_v3, %v3301_v43  ;;  %v3341_v38 = vadd.f32 %v3340_v15, %v3339_v14 }
 0x382   : > { %2764 = vst.msk [vmem:[%s280_s14] sm:$0xff] %vm2763_vm8, %v2757_v25  ;;  %v2760_v5 = vadd.f32 %v3341_v38, %v3301_v43 }
 0x384   : > { %2765 = vst.msk [vmem:[%s280_s14 + $0x8] sm:$0xff] %vm2763_vm8, %v2760_v5 }
 0x385 PF: > { %s17_s24 = sadd.s32 1, %s3806_s24  }
 0x386   : > { %p14_p4 = scmp.ge.s32.totalorder %s17_s24, 4  }
 0x388   :  { %16 = sbr.rel (!%p14_p4) target bundleno = 1 (0x1), region = 82 }

</bundles_post_ra>
